<compile_context>
chip_gen: v7x
topology: tpu7x:2x2x1
jax: 0.10.0
libtpu: 0.0.40
codegen_flags: <defaults>
</compile_context>

<pallas_src>
import functools

import jax
import jax.numpy as jnp
from jax.experimental import pallas as pl
from jax.experimental.pallas import tpu as pltpu


_VMEM_LIMIT = 48 * 1024 * 1024        # fits v5e/v6e (128 MiB) and v7x (64 MiB)
_LN_EPS = 1e-5


def _erf_approx(x):
    # Abramowitz & Stegun 7.1.26, max abs error ~1.5e-7; uses only Pallas-safe
    # primitives (abs, exp, mul/add, where).
    a1, a2, a3, a4, a5 = 0.254829592, -0.284496736, 1.421413741, -1.453152027, 1.061405429
    p = 0.3275911
    ax = jnp.abs(x)
    t = 1.0 / (1.0 + p * ax)
    poly = ((((a5 * t + a4) * t + a3) * t + a2) * t + a1) * t
    y = 1.0 - poly * jnp.exp(-ax * ax)
    return jnp.where(x < 0.0, -y, y)


def _gelu_erf(x):
    # exact (erf-based) GELU, matching torch.nn.GELU default
    return 0.5 * x * (1.0 + _erf_approx(x * 0.7071067811865476))


def _layernorm_f32(x, g, b, eps=_LN_EPS):
    mean = jnp.mean(x, axis=-1, keepdims=True)
    var = jnp.mean(jnp.square(x - mean), axis=-1, keepdims=True)
    return (x - mean) * jax.lax.rsqrt(var + eps) * g + b


def _dispatch_matrix(idx_col, n_tokens, dtype):
    # idx_col: [C, 1] int32  ->  one-hot dispatch [C, N]
    c = idx_col.shape[0]
    iota_cn = jax.lax.broadcasted_iota(jnp.int32, (c, n_tokens), 1)
    return (iota_cn == idx_col).astype(dtype)


def _combine_matrix(idx_row, gate_row, n_tokens, dtype):
    # idx_row/gate_row: [1, C]  ->  gate-weighted one-hot combine [N, C]
    c = idx_row.shape[1]
    iota_nc = jax.lax.broadcasted_iota(jnp.int32, (n_tokens, c), 0)
    return jnp.where(iota_nc == idx_row, gate_row, 0.0).astype(dtype)


# -----------------------------------------------------------------------------
# Experts-choose attention: fused LN -> dispatch -> per-expert MHSA -> combine,
# accumulated over the expert ("arbitrary") grid axis in a VMEM f32 scratch.
# Residual folded in at e==0; output written once at e==E-1.
# -----------------------------------------------------------------------------
def _attn_moe_kernel(x_ref, idxc_ref, idxr_ref, gate_ref,
                     lng_ref, lnb_ref, wqkv_ref, wproj_ref, bproj_ref,
                     o_ref, xn_sc, acc_sc, *, num_heads, head_dim, dim):
    e = pl.program_id(1)
    n_tokens = x_ref.shape[1]
    wdt = wqkv_ref.dtype

    @pl.when(e == 0)
    def _():
        x = x_ref[0].astype(jnp.float32)                      # [N, D]
        g = lng_ref[...].astype(jnp.float32)                  # [1, D]
        b = lnb_ref[...].astype(jnp.float32)                  # [1, D]
        xn_sc[...] = _layernorm_f32(x, g, b)
        acc_sc[...] = x                                       # residual init

    xn = xn_sc[...]                                           # [N, D] f32
    idx_col = idxc_ref[0, 0]                                  # [C, 1] int32
    idx_row = idxr_ref[0, 0]                                  # [1, C] int32
    gate_row = gate_ref[0, 0].astype(jnp.float32)             # [1, C]

    # dispatch: [C,N] @ [N,D] -> [C,D]
    disp = _dispatch_matrix(idx_col, n_tokens, wdt)
    xd = jnp.dot(disp, xn.astype(wdt), preferred_element_type=jnp.float32)

    # qkv projection (single matmul, full K=D on the MXU)
    qkv = jnp.dot(xd.astype(wdt), wqkv_ref[0],
                  preferred_element_type=jnp.float32)         # [C, 3D]
    cap = qkv.shape[0]
    scale = head_dim ** -0.5
    wp = wproj_ref[0]                                         # [D, D]

    # TODO(synk): per-head static loop keeps everything 2-D (robust Mosaic lowering);
    # for large head counts a head-batched einsum variant would pack the MXU better.
    y = jnp.zeros((cap, dim), jnp.float32)
    for h in range(num_heads):
        lo = h * head_dim
        hi = lo + head_dim
        q_h = (qkv[:, lo:hi] * scale).astype(wdt)             # [C, hd]
        k_h = qkv[:, dim + lo:dim + hi].astype(wdt)           # [C, hd]
        v_h = qkv[:, 2 * dim + lo:2 * dim + hi].astype(wdt)   # [C, hd]

        s = jnp.dot(q_h, k_h.T, preferred_element_type=jnp.float32)   # [C, C]
        m = jnp.max(s, axis=-1, keepdims=True)
        p = jnp.exp(s - m)
        l = jnp.sum(p, axis=-1, keepdims=True)
        p = p * pl.reciprocal(l, approx=True)                 # EUP divide

        o_h = jnp.dot(p.astype(wdt), v_h,
                      preferred_element_type=jnp.float32)     # [C, hd]
        # per-head slice of the output projection: sum_h o_h @ Wp[h*hd:(h+1)*hd, :]
        y = y + jnp.dot(o_h.astype(wdt), wp[lo:hi, :],
                        preferred_element_type=jnp.float32)   # [C, D]

    y = y + bproj_ref[0].astype(jnp.float32)                  # [C, D]

    # combine back to token positions: [N,C] @ [C,D] -> [N,D] (no transpose)
    comb = _combine_matrix(idx_row, gate_row, n_tokens, wdt)
    acc_sc[...] += jnp.dot(comb, y.astype(wdt),
                           preferred_element_type=jnp.float32)

    @pl.when(e == pl.num_programs(1) - 1)
    def _():
        o_ref[0] = acc_sc[...].astype(o_ref.dtype)


def attn_moe(x, idx_col, idx_row, gate_row, ln_g, ln_b,
             wqkv, wproj, bproj, num_heads):
    B, N, D = x.shape
    E = wqkv.shape[0]
    C = idx_col.shape[2]
    kernel = functools.partial(_attn_moe_kernel, num_heads=num_heads,
                               head_dim=D // num_heads, dim=D)
    return pl.pallas_call(
        kernel,
        out_shape=jax.ShapeDtypeStruct((B, N, D), x.dtype),
        grid=(B, E),
        in_specs=[
            pl.BlockSpec((1, N, D), lambda b, e: (b, 0, 0)),
            pl.BlockSpec((1, 1, C, 1), lambda b, e: (b, e, 0, 0)),
            pl.BlockSpec((1, 1, 1, C), lambda b, e: (b, e, 0, 0)),
            pl.BlockSpec((1, 1, 1, C), lambda b, e: (b, e, 0, 0)),
            pl.BlockSpec((1, D), lambda b, e: (0, 0)),
            pl.BlockSpec((1, D), lambda b, e: (0, 0)),
            pl.BlockSpec((1, D, 3 * D), lambda b, e: (e, 0, 0)),
            pl.BlockSpec((1, D, D), lambda b, e: (e, 0, 0)),
            pl.BlockSpec((1, 1, D), lambda b, e: (e, 0, 0)),
        ],
        out_specs=pl.BlockSpec((1, N, D), lambda b, e: (b, 0, 0)),
        scratch_shapes=[pltpu.VMEM((N, D), jnp.float32),   # LN(x) tile
                        pltpu.VMEM((N, D), jnp.float32)],  # accumulator
        compiler_params=pltpu.CompilerParams(
            dimension_semantics=("parallel", "arbitrary"),
            vmem_limit_bytes=_VMEM_LIMIT),
    )(x, idx_col, idx_row, gate_row,
      ln_g.reshape(1, D), ln_b.reshape(1, D),
      wqkv, wproj, bproj.reshape(E, 1, D))


# -----------------------------------------------------------------------------
# Experts-choose MLP: fused LN -> dispatch -> per-expert (fc1, gelu, fc2) ->
# combine; same accumulate-over-experts structure as the attention kernel.
# -----------------------------------------------------------------------------
def _mlp_moe_kernel(x_ref, idxc_ref, idxr_ref, gate_ref,
                    lng_ref, lnb_ref, w1_ref, b1_ref, w2_ref, b2_ref,
                    o_ref, xn_sc, acc_sc):
    e = pl.program_id(1)
    n_tokens = x_ref.shape[1]
    wdt = w1_ref.dtype

    @pl.when(e == 0)
    def _():
        x = x_ref[0].astype(jnp.float32)
        g = lng_ref[...].astype(jnp.float32)
        b = lnb_ref[...].astype(jnp.float32)
        xn_sc[...] = _layernorm_f32(x, g, b)
        acc_sc[...] = x

    xn = xn_sc[...]
    idx_col = idxc_ref[0, 0]
    idx_row = idxr_ref[0, 0]
    gate_row = gate_ref[0, 0].astype(jnp.float32)

    disp = _dispatch_matrix(idx_col, n_tokens, wdt)
    xd = jnp.dot(disp, xn.astype(wdt), preferred_element_type=jnp.float32)  # [C,D]

    h = jnp.dot(xd.astype(wdt), w1_ref[0], preferred_element_type=jnp.float32)
    h = _gelu_erf(h + b1_ref[0].astype(jnp.float32))                        # [C,H]
    y = jnp.dot(h.astype(wdt), w2_ref[0], preferred_element_type=jnp.float32)
    y = y + b2_ref[0].astype(jnp.float32)                                   # [C,D]

    comb = _combine_matrix(idx_row, gate_row, n_tokens, wdt)
    acc_sc[...] += jnp.dot(comb, y.astype(wdt),
                           preferred_element_type=jnp.float32)

    @pl.when(e == pl.num_programs(1) - 1)
    def _():
        o_ref[0] = acc_sc[...].astype(o_ref.dtype)


def mlp_moe(x, idx_col, idx_row, gate_row, ln_g, ln_b, w1, b1, w2, b2):
    B, N, D = x.shape
    E = w1.shape[0]
    H = w1.shape[-1]
    C = idx_col.shape[2]
    # TODO(synk): for production sizes on v7x (D=768, H=3072, f32), add a grid
    # axis tiling H (512-1024 chunks) or cast weights to bf16 to fit 64 MiB VMEM.
    return pl.pallas_call(
        _mlp_moe_kernel,
        out_shape=jax.ShapeDtypeStruct((B, N, D), x.dtype),
        grid=(B, E),
        in_specs=[
            pl.BlockSpec((1, N, D), lambda b, e: (b, 0, 0)),
            pl.BlockSpec((1, 1, C, 1), lambda b, e: (b, e, 0, 0)),
            pl.BlockSpec((1, 1, 1, C), lambda b, e: (b, e, 0, 0)),
            pl.BlockSpec((1, 1, 1, C), lambda b, e: (b, e, 0, 0)),
            pl.BlockSpec((1, D), lambda b, e: (0, 0)),
            pl.BlockSpec((1, D), lambda b, e: (0, 0)),
            pl.BlockSpec((1, D, H), lambda b, e: (e, 0, 0)),
            pl.BlockSpec((1, 1, H), lambda b, e: (e, 0, 0)),
            pl.BlockSpec((1, H, D), lambda b, e: (e, 0, 0)),
            pl.BlockSpec((1, 1, D), lambda b, e: (e, 0, 0)),
        ],
        out_specs=pl.BlockSpec((1, N, D), lambda b, e: (b, 0, 0)),
        scratch_shapes=[pltpu.VMEM((N, D), jnp.float32),
                        pltpu.VMEM((N, D), jnp.float32)],
        compiler_params=pltpu.CompilerParams(
            dimension_semantics=("parallel", "arbitrary"),
            vmem_limit_bytes=_VMEM_LIMIT),
    )(x, idx_col, idx_row, gate_row,
      ln_g.reshape(1, D), ln_b.reshape(1, D),
      w1, b1.reshape(E, 1, H), w2, b2.reshape(E, 1, D))


# -----------------------------------------------------------------------------
# Router (tiny matmul + top-k; plain JAX glue). Returns only indices + gates —
# the dense [B,E,C,N] masks are never materialized in HBM.
# -----------------------------------------------------------------------------
def router_topk(x, router_w, capacity):
    logits = jnp.einsum('bnd,de->bne', x.astype(jnp.float32),
                        router_w.astype(jnp.float32))          # [B, N, E]
    probs = jax.nn.softmax(logits, axis=-1)
    gates, idx = jax.lax.top_k(jnp.transpose(probs, (0, 2, 1)), capacity)  # [B,E,C]
    return idx.astype(jnp.int32), gates


# -----------------------------------------------------------------------------
# Full NmoeBlock forward (eval mode: drop_path = Identity, init_values=None ->
# LayerScale = Identity, dropouts = 0)
# -----------------------------------------------------------------------------
def nmoe_block_forward(x, params, *, num_heads, capacity_factor=1.0):
    B, N, D = x.shape
    capacity = int(capacity_factor * N)
    idx, gates = router_topk(x, params['router_w'], capacity)   # [B,E,C]

    idx_col = idx[..., None]                                    # [B,E,C,1]
    idx_row = idx[:, :, None, :]                                 # [B,E,1,C]
    gate_row = gates[:, :, None, :].astype(jnp.float32)          # [B,E,1,C]

    x1 = attn_moe(x, idx_col, idx_row, gate_row,
                  params['ln1_g'], params['ln1_b'],
                  params['wqkv'], params['wproj'], params['bproj'], num_heads)
    x2 = mlp_moe(x1, idx_col, idx_row, gate_row,
                 params['ln2_g'], params['ln2_b'],
                 params['w1'], params['b1'], params['w2'], params['b2'])
    return x2


# -----------------------------------------------------------------------------
# Pure-JAX reference (same math, exact softmax / exact erf-GELU) for correctness.
# -----------------------------------------------------------------------------
def reference_forward(x, params, *, num_heads, num_experts, capacity_factor=1.0):
    B, N, D = x.shape
    C = int(capacity_factor * N)
    hd = D // num_heads
    idx, gates = router_topk(x, params['router_w'], C)
    dispatch = jax.nn.one_hot(idx, N, dtype=jnp.float32)        # [B,E,C,N]
    combine = gates[..., None] * dispatch

    def ln(z, g, b):
        m = z.mean(-1, keepdims=True)
        v = ((z - m) ** 2).mean(-1, keepdims=True)
        return (z - m) / jnp.sqrt(v + 1e-5) * g + b

    def attn(xn):
        xd = jnp.einsum('becn,bnd->becd', dispatch, xn)
        qkv = jnp.einsum('becd,edf->becf', xd, params['wqkv'])
        q, k, v = jnp.split(qkv, 3, axis=-1)
        q = q.reshape(B, num_experts, C, num_heads, hd) * (hd ** -0.5)
        k = k.reshape(B, num_experts, C, num_heads, hd)
        v = v.reshape(B, num_experts, C, num_heads, hd)
        s = jnp.einsum('beqhi,bekhi->behqk', q, k)
        p = jax.nn.softmax(s, axis=-1)
        o = jnp.einsum('behqk,bekhi->beqhi', p, v).reshape(B, num_experts, C, D)
        y = jnp.einsum('becd,edf->becf', o, params['wproj']) \
            + params['bproj'][None, :, None, :]
        return jnp.einsum('becn,becd->bnd', combine, y)

    def mlp(xn):
        xd = jnp.einsum('becn,bnd->becd', dispatch, xn)
        h = jax.nn.gelu(jnp.einsum('becd,edh->bech', xd, params['w1'])
                        + params['b1'][None, :, None, :], approximate=False)
        y = jnp.einsum('bech,ehd->becd', h, params['w2']) \
            + params['b2'][None, :, None, :]
        return jnp.einsum('becn,becd->bnd', combine, y)

    x = x + attn(ln(x, params['ln1_g'], params['ln1_b']))
    x = x + mlp(ln(x, params['ln2_g'], params['ln2_b']))
    return x


if __name__ == "__main__":
    B, N, D = 2, 16, 32
    num_heads = 4
    num_experts = 4
    mlp_ratio = 4.0
    H = int(D * mlp_ratio)

    key = jax.random.PRNGKey(0)
    ks = jax.random.split(key, 9)
    params = {
        'router_w': 0.02 * jax.random.normal(ks[0], (D, num_experts), jnp.float32),
        'ln1_g': jnp.ones((D,), jnp.float32),
        'ln1_b': jnp.zeros((D,), jnp.float32),
        'wqkv': 0.02 * jax.random.normal(ks[1], (num_experts, D, 3 * D), jnp.float32),
        'wproj': 0.02 * jax.random.normal(ks[2], (num_experts, D, D), jnp.float32),
        'bproj': 0.01 * jax.random.normal(ks[3], (num_experts, D), jnp.float32),
        'ln2_g': jnp.ones((D,), jnp.float32),
        'ln2_b': jnp.zeros((D,), jnp.float32),
        'w1': 0.02 * jax.random.normal(ks[4], (num_experts, D, H), jnp.float32),
        'b1': 0.01 * jax.random.normal(ks[5], (num_experts, H), jnp.float32),
        'w2': 0.02 * jax.random.normal(ks[6], (num_experts, H, D), jnp.float32),
        'b2': 0.01 * jax.random.normal(ks[7], (num_experts, D), jnp.float32),
    }

    x = jax.random.normal(ks[8], (B, N, D), jnp.float32)

    out = nmoe_block_forward(x, params, num_heads=num_heads, capacity_factor=1.0)
    out = jax.block_until_ready(out)

    ref = reference_forward(x, params, num_heads=num_heads,
                            num_experts=num_experts, capacity_factor=1.0)
    ref = jax.block_until_ready(ref)

    err = float(jnp.max(jnp.abs(out - ref)))
    assert err < 2e-3, f"mismatch vs reference: max abs err {err}"
    print("KERNEL_OK")
</pallas_src>

<mosaic_0001>
module attributes {stable_mosaic.version = 11 : i64} {
  func.func @_attn_moe_kernel(%arg0: i32, %arg1: i32, %arg2: memref<1x16x32xf32, #tpu.memory_space<vmem>>, %arg3: memref<1x1x16x1xi32, #tpu.memory_space<vmem>>, %arg4: memref<1x1x1x16xi32, #tpu.memory_space<vmem>>, %arg5: memref<1x1x1x16xf32, #tpu.memory_space<vmem>>, %arg6: memref<1x32xf32, #tpu.memory_space<vmem>>, %arg7: memref<1x32xf32, #tpu.memory_space<vmem>>, %arg8: memref<1x32x96xf32, #tpu.memory_space<vmem>>, %arg9: memref<1x32x32xf32, #tpu.memory_space<vmem>>, %arg10: memref<1x1x32xf32, #tpu.memory_space<vmem>>, %arg11: memref<1x16x32xf32, #tpu.memory_space<vmem>>, %arg12: memref<16x32xf32, #tpu.memory_space<vmem>>, %arg13: memref<16x32xf32, #tpu.memory_space<vmem>>) attributes {dimension_semantics = [#tpu.dimension_semantics<parallel>, #tpu.dimension_semantics<arbitrary>], iteration_bounds = array<i64: 2, 4>, scalar_prefetch = 0 : i64, scratch_operands = 2 : i64, tpu.core_type = #tpu.core_type<tc>, window_params = [{transform_indices = @transform_0, window_bounds = array<i64: 1, 16, 32>}, {transform_indices = @transform_1, window_bounds = array<i64: 1, 1, 16, 1>}, {transform_indices = @transform_2, window_bounds = array<i64: 1, 1, 1, 16>}, {transform_indices = @transform_3, window_bounds = array<i64: 1, 1, 1, 16>}, {pipeline_mode = #tpu.pipeline_mode<synchronous>, transform_indices = @transform_4, window_bounds = array<i64: 1, 32>}, {pipeline_mode = #tpu.pipeline_mode<synchronous>, transform_indices = @transform_5, window_bounds = array<i64: 1, 32>}, {transform_indices = @transform_6, window_bounds = array<i64: 1, 32, 96>}, {transform_indices = @transform_7, window_bounds = array<i64: 1, 32, 32>}, {transform_indices = @transform_8, window_bounds = array<i64: 1, 1, 32>}, {transform_indices = @transform_9, window_bounds = array<i64: 1, 16, 32>}]} {
    %c0_i32 = arith.constant 0 : i32
    %0 = arith.cmpi eq, %arg1, %c0_i32 : i32
    %1 = arith.extui %0 : i1 to i32
    %c0_i32_0 = arith.constant 0 : i32
    %2 = arith.cmpi ne, %1, %c0_i32_0 : i32
    scf.if %2 {
      %c0_56 = arith.constant 0 : index
      %c0_57 = arith.constant 0 : index
      %c0_58 = arith.constant 0 : index
      %124 = vector.load %arg2[%c0_56, %c0_57, %c0_58] : memref<1x16x32xf32, #tpu.memory_space<vmem>>, vector<1x16x32xf32>
      %125 = vector.shape_cast %124 : vector<1x16x32xf32> to vector<16x32xf32>
      %c0_59 = arith.constant 0 : index
      %c0_60 = arith.constant 0 : index
      %126 = vector.load %arg6[%c0_59, %c0_60] : memref<1x32xf32, #tpu.memory_space<vmem>>, vector<1x32xf32>
      %c0_61 = arith.constant 0 : index
      %c0_62 = arith.constant 0 : index
      %127 = vector.load %arg7[%c0_61, %c0_62] : memref<1x32xf32, #tpu.memory_space<vmem>>, vector<1x32xf32>
      %cst_63 = arith.constant dense<0.000000e+00> : vector<16xf32>
      %128 = vector.multi_reduction <add>, %125, %cst_63 [1] : vector<16x32xf32> to vector<16xf32>
      %129 = vector.shape_cast %128 : vector<16xf32> to vector<16x1xf32>
      %cst_64 = arith.constant 3.200000e+01 : f32
      %130 = vector.broadcast %cst_64 : f32 to vector<16x1xf32>
      %131 = arith.divf %129, %130 : vector<16x1xf32>
      %132 = vector.broadcast %131 : vector<16x1xf32> to vector<16x32xf32>
      %133 = arith.subf %125, %132 : vector<16x32xf32>
      %134 = arith.mulf %133, %133 : vector<16x32xf32>
      %cst_65 = arith.constant dense<0.000000e+00> : vector<16xf32>
      %135 = vector.multi_reduction <add>, %134, %cst_65 [1] : vector<16x32xf32> to vector<16xf32>
      %136 = vector.shape_cast %135 : vector<16xf32> to vector<16x1xf32>
      %cst_66 = arith.constant 3.200000e+01 : f32
      %137 = vector.broadcast %cst_66 : f32 to vector<16x1xf32>
      %138 = arith.divf %136, %137 : vector<16x1xf32>
      %139 = vector.broadcast %131 : vector<16x1xf32> to vector<16x32xf32>
      %140 = arith.subf %125, %139 : vector<16x32xf32>
      %cst_67 = arith.constant 9.99999974E-6 : f32
      %141 = vector.broadcast %cst_67 : f32 to vector<16x1xf32>
      %142 = arith.addf %138, %141 : vector<16x1xf32>
      %143 = math.rsqrt %142 : vector<16x1xf32>
      %144 = vector.broadcast %143 : vector<16x1xf32> to vector<16x32xf32>
      %145 = arith.mulf %140, %144 : vector<16x32xf32>
      %146 = vector.broadcast %126 : vector<1x32xf32> to vector<16x32xf32>
      %147 = arith.mulf %145, %146 : vector<16x32xf32>
      %148 = vector.broadcast %127 : vector<1x32xf32> to vector<16x32xf32>
      %149 = arith.addf %147, %148 : vector<16x32xf32>
      %c0_68 = arith.constant 0 : index
      %c0_69 = arith.constant 0 : index
      %150 = vector.load %arg12[%c0_68, %c0_69] : memref<16x32xf32, #tpu.memory_space<vmem>>, vector<16x32xf32>
      tpu.vector_store %arg12[%c0_68, %c0_69], %149 {strides = array<i32>} : memref<16x32xf32, #tpu.memory_space<vmem>>, vector<16x32xf32>,
      %c0_70 = arith.constant 0 : index
      %c0_71 = arith.constant 0 : index
      %151 = vector.load %arg13[%c0_70, %c0_71] : memref<16x32xf32, #tpu.memory_space<vmem>>, vector<16x32xf32>
      tpu.vector_store %arg13[%c0_70, %c0_71], %125 {strides = array<i32>} : memref<16x32xf32, #tpu.memory_space<vmem>>, vector<16x32xf32>,
    } else {
    }
    %c0 = arith.constant 0 : index
    %c0_1 = arith.constant 0 : index
    %3 = vector.load %arg12[%c0, %c0_1] : memref<16x32xf32, #tpu.memory_space<vmem>>, vector<16x32xf32>
    %c0_2 = arith.constant 0 : index
    %c0_3 = arith.constant 0 : index
    %c0_4 = arith.constant 0 : index
    %c0_5 = arith.constant 0 : index
    %4 = vector.load %arg3[%c0_2, %c0_3, %c0_4, %c0_5] : memref<1x1x16x1xi32, #tpu.memory_space<vmem>>, vector<1x1x16x1xi32>
    %5 = vector.shape_cast %4 : vector<1x1x16x1xi32> to vector<16x1xi32>
    %c0_6 = arith.constant 0 : index
    %c0_7 = arith.constant 0 : index
    %c0_8 = arith.constant 0 : index
    %c0_9 = arith.constant 0 : index
    %6 = vector.load %arg4[%c0_6, %c0_7, %c0_8, %c0_9] : memref<1x1x1x16xi32, #tpu.memory_space<vmem>>, vector<1x1x1x16xi32>
    %7 = vector.shape_cast %6 : vector<1x1x1x16xi32> to vector<1x16xi32>
    %c0_10 = arith.constant 0 : index
    %c0_11 = arith.constant 0 : index
    %c0_12 = arith.constant 0 : index
    %c0_13 = arith.constant 0 : index
    %8 = vector.load %arg5[%c0_10, %c0_11, %c0_12, %c0_13] : memref<1x1x1x16xf32, #tpu.memory_space<vmem>>, vector<1x1x1x16xf32>
    %9 = vector.shape_cast %8 : vector<1x1x1x16xf32> to vector<1x16xf32>
    %10 = tpu.iota {dimensions = array<i32: 1>} : vector<16x16xi32>
    %11 = vector.broadcast %5 : vector<16x1xi32> to vector<16x16xi32>
    %12 = arith.cmpi eq, %10, %11 : vector<16x16xi32>
    %13 = arith.extui %12 : vector<16x16xi1> to vector<16x16xi32>
    %14 = arith.sitofp %13 : vector<16x16xi32> to vector<16x16xf32>
    %cst = arith.constant dense<0.000000e+00> : vector<16x32xf32>
    %15 = tpu.matmul %14, %3, %cst {dimension_numbers = #tpu.dot_dimension_numbers<[1], [0], [0], [1], [0, 0, 1, 1], [], []>} : vector<16x16xf32>, vector<16x32xf32>, vector<16x32xf32> -> vector<16x32xf32>
    %c0_14 = arith.constant 0 : index
    %c0_15 = arith.constant 0 : index
    %c0_16 = arith.constant 0 : index
    %16 = vector.load %arg8[%c0_14, %c0_15, %c0_16] : memref<1x32x96xf32, #tpu.memory_space<vmem>>, vector<1x32x96xf32>
    %17 = vector.shape_cast %16 : vector<1x32x96xf32> to vector<32x96xf32>
    %cst_17 = arith.constant dense<0.000000e+00> : vector<16x96xf32>
    %18 = tpu.matmul %15, %17, %cst_17 {dimension_numbers = #tpu.dot_dimension_numbers<[1], [0], [0], [1], [0, 0, 1, 1], [], []>} : vector<16x32xf32>, vector<32x96xf32>, vector<16x96xf32> -> vector<16x96xf32>
    %c0_18 = arith.constant 0 : index
    %c0_19 = arith.constant 0 : index
    %c0_20 = arith.constant 0 : index
    %19 = vector.load %arg9[%c0_18, %c0_19, %c0_20] : memref<1x32x32xf32, #tpu.memory_space<vmem>>, vector<1x32x32xf32>
    %20 = vector.shape_cast %19 : vector<1x32x32xf32> to vector<32x32xf32>
    %cst_21 = arith.constant 0.000000e+00 : f32
    %21 = vector.broadcast %cst_21 : f32 to vector<16x32xf32>
    %22 = vector.extract_strided_slice %18 {offsets = [0, 0], sizes = [16, 8], strides = [1, 1]} : vector<16x96xf32> to vector<16x8xf32>
    %cst_22 = arith.constant 0.353553385 : f32
    %23 = vector.broadcast %cst_22 : f32 to vector<16x8xf32>
    %24 = arith.mulf %22, %23 : vector<16x8xf32>
    %25 = vector.extract_strided_slice %18 {offsets = [0, 32], sizes = [16, 8], strides = [1, 1]} : vector<16x96xf32> to vector<16x8xf32>
    %26 = vector.extract_strided_slice %18 {offsets = [0, 64], sizes = [16, 8], strides = [1, 1]} : vector<16x96xf32> to vector<16x8xf32>
    %27 = tpu.transpose %25, [1, 0] : vector<16x8xf32> -> vector<8x16xf32>
    %cst_23 = arith.constant dense<0.000000e+00> : vector<16x16xf32>
    %28 = tpu.matmul %24, %27, %cst_23 {dimension_numbers = #tpu.dot_dimension_numbers<[1], [0], [0], [1], [0, 0, 1, 1], [], []>} : vector<16x8xf32>, vector<8x16xf32>, vector<16x16xf32> -> vector<16x16xf32>
    %cst_24 = arith.constant dense<0xFF800000> : vector<16xf32>
    %29 = vector.multi_reduction <maximumf>, %28, %cst_24 [1] : vector<16x16xf32> to vector<16xf32>
    %30 = vector.shape_cast %29 : vector<16xf32> to vector<16x1xf32>
    %31 = vector.broadcast %30 : vector<16x1xf32> to vector<16x16xf32>
    %32 = arith.subf %28, %31 : vector<16x16xf32>
    %33 = math.exp %32 : vector<16x16xf32>
    %cst_25 = arith.constant dense<0.000000e+00> : vector<16xf32>
    %34 = vector.multi_reduction <add>, %33, %cst_25 [1] : vector<16x16xf32> to vector<16xf32>
    %35 = vector.shape_cast %34 : vector<16xf32> to vector<16x1xf32>
    %36 = tpu.reciprocal %35 {approx = true} : vector<16x1xf32> -> vector<16x1xf32>
    %37 = vector.broadcast %36 : vector<16x1xf32> to vector<16x16xf32>
    %38 = arith.mulf %33, %37 : vector<16x16xf32>
    %cst_26 = arith.constant dense<0.000000e+00> : vector<16x8xf32>
    %39 = tpu.matmul %38, %26, %cst_26 {dimension_numbers = #tpu.dot_dimension_numbers<[1], [0], [0], [1], [0, 0, 1, 1], [], []>} : vector<16x16xf32>, vector<16x8xf32>, vector<16x8xf32> -> vector<16x8xf32>
    %40 = vector.extract_strided_slice %20 {offsets = [0, 0], sizes = [8, 32], strides = [1, 1]} : vector<32x32xf32> to vector<8x32xf32>
    %cst_27 = arith.constant dense<0.000000e+00> : vector<16x32xf32>
    %41 = tpu.matmul %39, %40, %cst_27 {dimension_numbers = #tpu.dot_dimension_numbers<[1], [0], [0], [1], [0, 0, 1, 1], [], []>} : vector<16x8xf32>, vector<8x32xf32>, vector<16x32xf32> -> vector<16x32xf32>
    %42 = arith.addf %21, %41 : vector<16x32xf32>
    %43 = vector.extract_strided_slice %18 {offsets = [0, 8], sizes = [16, 8], strides = [1, 1]} : vector<16x96xf32> to vector<16x8xf32>
    %cst_28 = arith.constant 0.353553385 : f32
    %44 = vector.broadcast %cst_28 : f32 to vector<16x8xf32>
    %45 = arith.mulf %43, %44 : vector<16x8xf32>
    %46 = vector.extract_strided_slice %18 {offsets = [0, 40], sizes = [16, 8], strides = [1, 1]} : vector<16x96xf32> to vector<16x8xf32>
    %47 = vector.extract_strided_slice %18 {offsets = [0, 72], sizes = [16, 8], strides = [1, 1]} : vector<16x96xf32> to vector<16x8xf32>
    %48 = tpu.transpose %46, [1, 0] : vector<16x8xf32> -> vector<8x16xf32>
    %cst_29 = arith.constant dense<0.000000e+00> : vector<16x16xf32>
    %49 = tpu.matmul %45, %48, %cst_29 {dimension_numbers = #tpu.dot_dimension_numbers<[1], [0], [0], [1], [0, 0, 1, 1], [], []>} : vector<16x8xf32>, vector<8x16xf32>, vector<16x16xf32> -> vector<16x16xf32>
    %cst_30 = arith.constant dense<0xFF800000> : vector<16xf32>
    %50 = vector.multi_reduction <maximumf>, %49, %cst_30 [1] : vector<16x16xf32> to vector<16xf32>
    %51 = vector.shape_cast %50 : vector<16xf32> to vector<16x1xf32>
    %52 = vector.broadcast %51 : vector<16x1xf32> to vector<16x16xf32>
    %53 = arith.subf %49, %52 : vector<16x16xf32>
    %54 = math.exp %53 : vector<16x16xf32>
    %cst_31 = arith.constant dense<0.000000e+00> : vector<16xf32>
    %55 = vector.multi_reduction <add>, %54, %cst_31 [1] : vector<16x16xf32> to vector<16xf32>
    %56 = vector.shape_cast %55 : vector<16xf32> to vector<16x1xf32>
    %57 = tpu.reciprocal %56 {approx = true} : vector<16x1xf32> -> vector<16x1xf32>
    %58 = vector.broadcast %57 : vector<16x1xf32> to vector<16x16xf32>
    %59 = arith.mulf %54, %58 : vector<16x16xf32>
    %cst_32 = arith.constant dense<0.000000e+00> : vector<16x8xf32>
    %60 = tpu.matmul %59, %47, %cst_32 {dimension_numbers = #tpu.dot_dimension_numbers<[1], [0], [0], [1], [0, 0, 1, 1], [], []>} : vector<16x16xf32>, vector<16x8xf32>, vector<16x8xf32> -> vector<16x8xf32>
    %61 = vector.extract_strided_slice %20 {offsets = [8, 0], sizes = [8, 32], strides = [1, 1]} : vector<32x32xf32> to vector<8x32xf32>
    %cst_33 = arith.constant dense<0.000000e+00> : vector<16x32xf32>
    %62 = tpu.matmul %60, %61, %cst_33 {dimension_numbers = #tpu.dot_dimension_numbers<[1], [0], [0], [1], [0, 0, 1, 1], [], []>} : vector<16x8xf32>, vector<8x32xf32>, vector<16x32xf32> -> vector<16x32xf32>
    %63 = arith.addf %42, %62 : vector<16x32xf32>
    %64 = vector.extract_strided_slice %18 {offsets = [0, 16], sizes = [16, 8], strides = [1, 1]} : vector<16x96xf32> to vector<16x8xf32>
    %cst_34 = arith.constant 0.353553385 : f32
    %65 = vector.broadcast %cst_34 : f32 to vector<16x8xf32>
    %66 = arith.mulf %64, %65 : vector<16x8xf32>
    %67 = vector.extract_strided_slice %18 {offsets = [0, 48], sizes = [16, 8], strides = [1, 1]} : vector<16x96xf32> to vector<16x8xf32>
    %68 = vector.extract_strided_slice %18 {offsets = [0, 80], sizes = [16, 8], strides = [1, 1]} : vector<16x96xf32> to vector<16x8xf32>
    %69 = tpu.transpose %67, [1, 0] : vector<16x8xf32> -> vector<8x16xf32>
    %cst_35 = arith.constant dense<0.000000e+00> : vector<16x16xf32>
    %70 = tpu.matmul %66, %69, %cst_35 {dimension_numbers = #tpu.dot_dimension_numbers<[1], [0], [0], [1], [0, 0, 1, 1], [], []>} : vector<16x8xf32>, vector<8x16xf32>, vector<16x16xf32> -> vector<16x16xf32>
    %cst_36 = arith.constant dense<0xFF800000> : vector<16xf32>
    %71 = vector.multi_reduction <maximumf>, %70, %cst_36 [1] : vector<16x16xf32> to vector<16xf32>
    %72 = vector.shape_cast %71 : vector<16xf32> to vector<16x1xf32>
    %73 = vector.broadcast %72 : vector<16x1xf32> to vector<16x16xf32>
    %74 = arith.subf %70, %73 : vector<16x16xf32>
    %75 = math.exp %74 : vector<16x16xf32>
    %cst_37 = arith.constant dense<0.000000e+00> : vector<16xf32>
    %76 = vector.multi_reduction <add>, %75, %cst_37 [1] : vector<16x16xf32> to vector<16xf32>
    %77 = vector.shape_cast %76 : vector<16xf32> to vector<16x1xf32>
    %78 = tpu.reciprocal %77 {approx = true} : vector<16x1xf32> -> vector<16x1xf32>
    %79 = vector.broadcast %78 : vector<16x1xf32> to vector<16x16xf32>
    %80 = arith.mulf %75, %79 : vector<16x16xf32>
    %cst_38 = arith.constant dense<0.000000e+00> : vector<16x8xf32>
    %81 = tpu.matmul %80, %68, %cst_38 {dimension_numbers = #tpu.dot_dimension_numbers<[1], [0], [0], [1], [0, 0, 1, 1], [], []>} : vector<16x16xf32>, vector<16x8xf32>, vector<16x8xf32> -> vector<16x8xf32>
    %82 = vector.extract_strided_slice %20 {offsets = [16, 0], sizes = [8, 32], strides = [1, 1]} : vector<32x32xf32> to vector<8x32xf32>
    %cst_39 = arith.constant dense<0.000000e+00> : vector<16x32xf32>
    %83 = tpu.matmul %81, %82, %cst_39 {dimension_numbers = #tpu.dot_dimension_numbers<[1], [0], [0], [1], [0, 0, 1, 1], [], []>} : vector<16x8xf32>, vector<8x32xf32>, vector<16x32xf32> -> vector<16x32xf32>
    %84 = arith.addf %63, %83 : vector<16x32xf32>
    %85 = vector.extract_strided_slice %18 {offsets = [0, 24], sizes = [16, 8], strides = [1, 1]} : vector<16x96xf32> to vector<16x8xf32>
    %cst_40 = arith.constant 0.353553385 : f32
    %86 = vector.broadcast %cst_40 : f32 to vector<16x8xf32>
    %87 = arith.mulf %85, %86 : vector<16x8xf32>
    %88 = vector.extract_strided_slice %18 {offsets = [0, 56], sizes = [16, 8], strides = [1, 1]} : vector<16x96xf32> to vector<16x8xf32>
    %89 = vector.extract_strided_slice %18 {offsets = [0, 88], sizes = [16, 8], strides = [1, 1]} : vector<16x96xf32> to vector<16x8xf32>
    %90 = tpu.transpose %88, [1, 0] : vector<16x8xf32> -> vector<8x16xf32>
    %cst_41 = arith.constant dense<0.000000e+00> : vector<16x16xf32>
    %91 = tpu.matmul %87, %90, %cst_41 {dimension_numbers = #tpu.dot_dimension_numbers<[1], [0], [0], [1], [0, 0, 1, 1], [], []>} : vector<16x8xf32>, vector<8x16xf32>, vector<16x16xf32> -> vector<16x16xf32>
    %cst_42 = arith.constant dense<0xFF800000> : vector<16xf32>
    %92 = vector.multi_reduction <maximumf>, %91, %cst_42 [1] : vector<16x16xf32> to vector<16xf32>
    %93 = vector.shape_cast %92 : vector<16xf32> to vector<16x1xf32>
    %94 = vector.broadcast %93 : vector<16x1xf32> to vector<16x16xf32>
    %95 = arith.subf %91, %94 : vector<16x16xf32>
    %96 = math.exp %95 : vector<16x16xf32>
    %cst_43 = arith.constant dense<0.000000e+00> : vector<16xf32>
    %97 = vector.multi_reduction <add>, %96, %cst_43 [1] : vector<16x16xf32> to vector<16xf32>
    %98 = vector.shape_cast %97 : vector<16xf32> to vector<16x1xf32>
    %99 = tpu.reciprocal %98 {approx = true} : vector<16x1xf32> -> vector<16x1xf32>
    %100 = vector.broadcast %99 : vector<16x1xf32> to vector<16x16xf32>
    %101 = arith.mulf %96, %100 : vector<16x16xf32>
    %cst_44 = arith.constant dense<0.000000e+00> : vector<16x8xf32>
    %102 = tpu.matmul %101, %89, %cst_44 {dimension_numbers = #tpu.dot_dimension_numbers<[1], [0], [0], [1], [0, 0, 1, 1], [], []>} : vector<16x16xf32>, vector<16x8xf32>, vector<16x8xf32> -> vector<16x8xf32>
    %103 = vector.extract_strided_slice %20 {offsets = [24, 0], sizes = [8, 32], strides = [1, 1]} : vector<32x32xf32> to vector<8x32xf32>
    %cst_45 = arith.constant dense<0.000000e+00> : vector<16x32xf32>
    %104 = tpu.matmul %102, %103, %cst_45 {dimension_numbers = #tpu.dot_dimension_numbers<[1], [0], [0], [1], [0, 0, 1, 1], [], []>} : vector<16x8xf32>, vector<8x32xf32>, vector<16x32xf32> -> vector<16x32xf32>
    %105 = arith.addf %84, %104 : vector<16x32xf32>
    %c0_46 = arith.constant 0 : index
    %c0_47 = arith.constant 0 : index
    %c0_48 = arith.constant 0 : index
    %106 = vector.load %arg10[%c0_46, %c0_47, %c0_48] : memref<1x1x32xf32, #tpu.memory_space<vmem>>, vector<1x1x32xf32>
    %107 = vector.shape_cast %106 : vector<1x1x32xf32> to vector<1x32xf32>
    %108 = vector.broadcast %107 : vector<1x32xf32> to vector<16x32xf32>
    %109 = arith.addf %105, %108 : vector<16x32xf32>
    %110 = tpu.iota {dimensions = array<i32: 0>} : vector<16x16xi32>
    %111 = vector.broadcast %7 : vector<1x16xi32> to vector<16x16xi32>
    %112 = arith.cmpi eq, %110, %111 : vector<16x16xi32>
    %cst_49 = arith.constant 0.000000e+00 : f32
    %113 = vector.shape_cast %9 : vector<1x16xf32> to vector<1x16xf32>
    %114 = vector.broadcast %113 : vector<1x16xf32> to vector<16x16xf32>
    %115 = vector.broadcast %cst_49 : f32 to vector<16x16xf32>
    %116 = arith.select %112, %114, %115 : vector<16x16xi1>, vector<16x16xf32>
    %c0_50 = arith.constant 0 : index
    %c0_51 = arith.constant 0 : index
    %117 = vector.load %arg13[%c0_50, %c0_51] : memref<16x32xf32, #tpu.memory_space<vmem>>, vector<16x32xf32>
    %cst_52 = arith.constant dense<0.000000e+00> : vector<16x32xf32>
    %118 = tpu.matmul %116, %109, %cst_52 {dimension_numbers = #tpu.dot_dimension_numbers<[1], [0], [0], [1], [0, 0, 1, 1], [], []>} : vector<16x16xf32>, vector<16x32xf32>, vector<16x32xf32> -> vector<16x32xf32>
    %119 = arith.addf %117, %118 : vector<16x32xf32>
    %c0_53 = arith.constant 0 : index
    %c0_54 = arith.constant 0 : index
    %120 = vector.load %arg13[%c0_53, %c0_54] : memref<16x32xf32, #tpu.memory_space<vmem>>, vector<16x32xf32>
    tpu.vector_store %arg13[%c0_53, %c0_54], %119 {strides = array<i32>} : memref<16x32xf32, #tpu.memory_space<vmem>>, vector<16x32xf32>,
    %c3_i32 = arith.constant 3 : i32
    %121 = arith.cmpi eq, %arg1, %c3_i32 : i32
    %122 = arith.extui %121 : i1 to i32
    %c0_i32_55 = arith.constant 0 : i32
    %123 = arith.cmpi ne, %122, %c0_i32_55 : i32
    scf.if %123 {
      %c0_56 = arith.constant 0 : index
      %c0_57 = arith.constant 0 : index
      %124 = vector.load %arg13[%c0_56, %c0_57] : memref<16x32xf32, #tpu.memory_space<vmem>>, vector<16x32xf32>
      %c0_58 = arith.constant 0 : index
      %c0_59 = arith.constant 0 : index
      %c0_60 = arith.constant 0 : index
      %125 = vector.load %arg11[%c0_58, %c0_59, %c0_60] : memref<1x16x32xf32, #tpu.memory_space<vmem>>, vector<1x16x32xf32>
      %126 = vector.shape_cast %125 : vector<1x16x32xf32> to vector<16x32xf32>
      %127 = vector.shape_cast %124 : vector<16x32xf32> to vector<1x16x32xf32>
      tpu.vector_store %arg11[%c0_58, %c0_59, %c0_60], %127 {strides = array<i32>} : memref<1x16x32xf32, #tpu.memory_space<vmem>>, vector<1x16x32xf32>,
    } else {
    }
    return
  }
  func.func @transform_0(%arg0: i32, %arg1: i32) -> (i32, i32, i32) {
    %c0_i32 = arith.constant 0 : i32
    %c0_i32_0 = arith.constant 0 : i32
    %c0_i32_1 = arith.constant 0 : i32
    return %arg0, %c0_i32, %c0_i32_0 : i32, i32, i32
  }
  func.func @transform_1(%arg0: i32, %arg1: i32) -> (i32, i32, i32, i32) {
    %c0_i32 = arith.constant 0 : i32
    %c0_i32_0 = arith.constant 0 : i32
    %c0_i32_1 = arith.constant 0 : i32
    return %arg0, %arg1, %c0_i32, %c0_i32_0 : i32, i32, i32, i32
  }
  func.func @transform_2(%arg0: i32, %arg1: i32) -> (i32, i32, i32, i32) {
    %c0_i32 = arith.constant 0 : i32
    %c0_i32_0 = arith.constant 0 : i32
    %c0_i32_1 = arith.constant 0 : i32
    return %arg0, %arg1, %c0_i32, %c0_i32_0 : i32, i32, i32, i32
  }
  func.func @transform_3(%arg0: i32, %arg1: i32) -> (i32, i32, i32, i32) {
    %c0_i32 = arith.constant 0 : i32
    %c0_i32_0 = arith.constant 0 : i32
    %c0_i32_1 = arith.constant 0 : i32
    return %arg0, %arg1, %c0_i32, %c0_i32_0 : i32, i32, i32, i32
  }
  func.func @transform_4(%arg0: i32, %arg1: i32) -> (i32, i32) {
    %c0_i32 = arith.constant 0 : i32
    %c0_i32_0 = arith.constant 0 : i32
    %c0_i32_1 = arith.constant 0 : i32
    return %c0_i32, %c0_i32_0 : i32, i32
  }
  func.func @transform_5(%arg0: i32, %arg1: i32) -> (i32, i32) {
    %c0_i32 = arith.constant 0 : i32
    %c0_i32_0 = arith.constant 0 : i32
    %c0_i32_1 = arith.constant 0 : i32
    return %c0_i32, %c0_i32_0 : i32, i32
  }
  func.func @transform_6(%arg0: i32, %arg1: i32) -> (i32, i32, i32) {
    %c0_i32 = arith.constant 0 : i32
    %c0_i32_0 = arith.constant 0 : i32
    %c0_i32_1 = arith.constant 0 : i32
    return %arg1, %c0_i32, %c0_i32_0 : i32, i32, i32
  }
  func.func @transform_7(%arg0: i32, %arg1: i32) -> (i32, i32, i32) {
    %c0_i32 = arith.constant 0 : i32
    %c0_i32_0 = arith.constant 0 : i32
    %c0_i32_1 = arith.constant 0 : i32
    return %arg1, %c0_i32, %c0_i32_0 : i32, i32, i32
  }
  func.func @transform_8(%arg0: i32, %arg1: i32) -> (i32, i32, i32) {
    %c0_i32 = arith.constant 0 : i32
    %c0_i32_0 = arith.constant 0 : i32
    %c0_i32_1 = arith.constant 0 : i32
    return %arg1, %c0_i32, %c0_i32_0 : i32, i32, i32
  }
  func.func @transform_9(%arg0: i32, %arg1: i32) -> (i32, i32, i32) {
    %c0_i32 = arith.constant 0 : i32
    %c0_i32_0 = arith.constant 0 : i32
    %c0_i32_1 = arith.constant 0 : i32
    return %arg0, %c0_i32, %c0_i32_0 : i32, i32, i32
  }
}

</mosaic_0001>

<bundles_post_ra>
// kernel: tpu_custom_call.1
= control target key start
LH: loop header
LB: loop body
LE: loop exit
PB: predicated region body
PF: predicated region fallthrough
CT: control target
= control target key end

     0   :  { %s3475_s0 = inlined_call_operand.hbm [shape: f32[2,16,32], index: 0, kind: input, shape index: {}]   ;;  %s3476_s1 = inlined_call_operand.vmem [shape: s32[2,4,16,1], index: 1, kind: input, shape index: {}]   ;;  %s3477_s2 = inlined_call_operand.vmem [shape: s32[2,4,1,16], index: 2, kind: input, shape index: {}]   ;;  %s3478_s3 = inlined_call_operand.vmem [shape: f32[2,4,1,16], index: 3, kind: input, shape index: {}]   ;;  %s3479_s4 = inlined_call_operand.vmem [shape: f32[1,32], index: 4, kind: input, shape index: {}]   ;;  %s3480_s5 = inlined_call_operand.vmem [shape: f32[1,32], index: 5, kind: input, shape index: {}]   ;;  %s3481_s6 = inlined_call_operand.vmem [shape: f32[4,32,96], index: 6, kind: input, shape index: {}]   ;;  %s3482_s7 = inlined_call_operand.hbm [shape: f32[4,32,32], index: 7, kind: input, shape index: {}]   ;;  %s3483_s8 = inlined_call_operand.vmem [shape: f32[4,1,32], index: 8, kind: input, shape index: {}]   ;;  %s3484_s9 = inlined_call_operand.hbm [shape: f32[2,16,32], index: 9, kind: output, shape index: {}]  }
   0x1   :  { %3504 = sst [smem:[#allocation25_spill]] %s3475_s0 }
   0x2   :  { %3505 = sst [smem:[#allocation26_spill]] %s3479_s4 }
   0x3   :  { %3506 = sst [smem:[#allocation27_spill]] %s3480_s5 }
   0x4   :  { %3507 = sst [smem:[#allocation28_spill]] %s3481_s6 }
   0x5   :  { %3508 = sst [smem:[#allocation29_spill]] %s3482_s7 }
   0x6   :  { %3509 = sst [smem:[#allocation30_spill]] %s3483_s8 }
   0x7   :  { %3510 = sst [smem:[#allocation31_spill]] %s3484_s9 }
   0x8   :  { %14 = vsyncpa [#allocation5], 0 }
   0x9   :  { %16 = vsyncpa [#allocation5 + $0x1], 0 }
   0xa   :  { %17 = vsyncpa [#allocation8], 0 }
   0xb   :  { %19 = vsyncpa [#allocation8 + $0x1], 0 }
   0xc   :  { %20 = vsyncpa [#allocation6], 0 }
   0xd   :  { %22 = vsyncpa [#allocation6 + $0x1], 0  ;;  %s2977_s30 = smov 0   ;;  %s2979_s10 = smov 0  }
   0xe   :  { %s2981_s11 = smov 0   ;;  %s2983_s12 = smov 0  }
   0xf   :  { %s2985_s13 = smov 0   ;;  %s2987_s14 = smov 0  }
  0x10   :  { %s2989_s15 = smov 0   ;;  %s2991_s16 = smov 0  }
  0x11   :  { %s2993_s17 = smov 0   ;;  %s2995_s18 = smov 0  }
  0x12   :  { %s2997_s19 = smov 0  }
  0x13 LB: > { %3511 = sst [smem:[#allocation13_spill]] %s2873_s11  ;;  %s2220_s20 = sadd.s32 4294967295, %s2905_s19   ;;  %s2905_s19 = sphi %s2997_s19, %s28_s19   ;;  %s2901_s18 = sphi %s2995_s18, %s3564_s18   ;;  %s2897_s17 = sphi %s2993_s17, %s3563_s17   ;;  %s2893_s16 = sphi %s2991_s16, %s3562_s16   ;;  %s2889_s15 = sphi %s2989_s15, %s3561_s15   ;;  %s2885_s14 = sphi %s2987_s14, %s3560_s14   ;;  %s2881_s13 = sphi %s2985_s13, %s3559_s13   ;;  %s2877_s12 = sphi %s2983_s12, %s3558_s12   ;;  %s2873_s11 = sphi %s2981_s11, %s3567_s11   ;;  %s2869_s10 = sphi %s2979_s10, %s3566_s10   ;;  %s2865_s30 = sphi %s2977_s30, %s3565_s30  }
  0x14   : > { %3512 = sst [smem:[#allocation14_spill]] %s2877_s12  ;;  %s2221_s21 = sadd.s32 4294967294, %s2905_s19  }
  0x15   : > { %3513 = sst [smem:[#allocation15_spill]] %s2881_s13  ;;  %p54_p0 = scmp.ne.s32.totalorder %s2885_s14, %s2881_s13 }
  0x16   : > { %3514 = sst [smem:[#allocation16_spill]] %s2885_s14  ;;  %p3491_p1 = scmp.eq.s32.totalorder %s2905_s19, 0 }
  0x17   : > { %3515 = sst [smem:[#allocation17_spill]] %s2897_s17  ;;  %p60_p2 = scmp.ne.s32.totalorder %s2881_s13, %s2877_s12 }
  0x18   : > { %3516 = sst [smem:[#allocation18_spill]] %s2901_s18  ;;  %p3041_p3 = scmp.eq.s32.totalorder %s2220_s20, 0 }
  0x19   : > { %p3047_p4 = por %p3491_p1, %p54_p0  ;;  %p288_p5 = scmp.eq.s32.totalorder %s2220_s20, 7 }
  0x1a   : > { %p3053_p6 = por %p3041_p3, %p60_p2  ;;  %p294_p7 = scmp.eq.s32.totalorder %s2221_s21, 7 }
  0x1b   : > { %p3057_p8 = por %p288_p5, %p54_p0  ;;  %p3490_p10 = scmp.lt.s32.totalorder %s2905_s19, 8 }
  0x1c   : > { %s3519_s26 = scalar_select %p3053_p6, 1, 0 }
  0x1d   : > { %s3520_s27 = scalar_select %p3057_p8, 1, 0 }
  0x1e   : > { %p3061_p9 = por %p294_p7, %p60_p2  ;;  %s320_s29 = sand.u32 1, %s2885_s14  }
  0x1f   : > { %3521 = sst [smem:[#allocation19_spill]] %s3520_s27  ;;  %s2293_s23 = sshll.u32 %s2901_s18, 8 }
  0x20   : > { %s3522_s28 = scalar_select %p3061_p9, 1, 0 }
  0x21   : > { %s2224_s22 = sshll.u32 %s320_s29, 4  ;;  %s3524_s0 = sld [smem:[#allocation25_spill]] }
  0x22   : > { %3523 = sst [smem:[#allocation20_spill]] %s3522_s28  ;;  %s324_s21 = scalar_lea.vmem [#allocation4], %s2224_s22 }
  0x23   : > { %s331_s5 = sshll.u32 %s324_s21, 4  ;;  %p3077_p11 = pnand %p3490_p10, %p3047_p4  ;;  %s3081_s5 = int_to_ptr.vmem [resolvable:$true] %s331_s5 }
  0x24   : > { %s3083_s28 = scalar_lea.sflag [#allocation5], %s320_s29 }
  0x25   : > { %p2721_p13 = pneg %p3077_p11 }
  0x27   : > { %s3071_s9 = scalar_lea.hbm %s3524_s0, %s2293_s23  ;;  %s2724_s25 = scalar_lea.hbm %s3524_s0, 512 }
  0x28   : > { %s2719_s12 = scalar_lea.hbm %s3071_s9, 256  ;;  %p2725_p4 = scmp.lt.u32.totalorder %s3071_s9, %s3524_s0 }
  0x29   : > { %p2720_p12 = scmp.ne.s32.totalorder %s3071_s9, %s2719_s12  ;;  %p2726_p5 = scmp.lt.u32.totalorder %s2724_s25, %s2719_s12 }
  0x2a   : > { %p2728_p10 = scmp.lt.u32.totalorder %s2719_s12, %s3071_s9 }
  0x2b   : > { %p2722_p0 = pnand %p2721_p13, %p2720_p12  ;;  %p2727_p7 = por %p2726_p5, %p2725_p4 }
  0x2d   : > { %p2723_p2 = pneg %p2722_p0  ;;  %p2729_p1 = por %p2728_p10, %p2727_p7 }
  0x2f   : > { %p2730_p9 = pnand %p2729_p1, %p2723_p2 }
  0x31   : > { %2733 = shalt.err (!%p2730_p9)
}
  0x32   : > { %s2734_s29 = scalar_lea.vmem %s3081_s5, 256  ;;  %s2907_s22 = smov [#allocation4]  }
  0x33   : > { %p2735_p12 = scmp.ne.s32.totalorder %s3081_s5, %s2734_s29  ;;  %s2739_s23 = sshll.u32 %s2907_s22, 4  ;;  %s2740_s23 = int_to_ptr.vmem [resolvable:$false] %s2739_s23 }
  0x34   : > { %s2741_s20 = scalar_lea.vmem %s2740_s23, 512  ;;  %p2742_p6 = scmp.lt.s32.totalorder %s3081_s5, %s2740_s23 }
  0x35   : > { %p2737_p0 = pnand %p2735_p12, %p2721_p13  ;;  %p2743_p4 = scmp.lt.s32.totalorder %s2741_s20, %s2734_s29 }
  0x37   : > { %p2738_p8 = pneg %p2737_p0  ;;  %p2744_p5 = por %p2743_p4, %p2742_p6 }
  0x39   : > { %p2745_p10 = pnand %p2744_p5, %p2738_p8 }
  0x3b   : > { %2748 = shalt.err (!%p2745_p10)
}
  0x3c   : > { %s3494_s12 = smov 128   ;;  %s3495_s25 = smov 8  }
  0x3d   : > { %2527 = dma.hbm_to_vmem [thread:$0]  (!%p3077_p11), %s3071_s9, 256, %s3081_s5, %s3083_s28, %s3494_s12, %s3494_s12, %s3495_s25  }
  0x3e   : > { %p2230_p1 = scmp.ge.s32.totalorder %s2905_s19, 1  ;;  %p406_p6 = scmp.lt.s32.totalorder %s2905_s19, 9 }
  0x3f   : > { %s37_s29 = sadd.s32 1, %s2897_s17  ;;  %s225_s22 = sadd.s32 1, %s2873_s11 }
  0x40   : > { %p3116_p8 = pnand %p2230_p1, %p406_p6  ;;  %p38_p9 = scmp.ge.s32.totalorder %s37_s29, 4 }
  0x41   : > { %p232_p13 = scmp.ne.s32.totalorder %s2873_s11, %s2869_s10  ;;  %p238_p2 = scmp.ne.s32.totalorder %s2869_s10, %s2865_s30 }
  0x42   : > { %s3569_s29 = smov (%p38_p9, %s37_s29), 0  ;;  %s3528_s5 = sadd.s32 1, %s2901_s18 }
  0x43   : > { %3527 = sst [smem:[#allocation21_spill]] %s3569_s29  ;;  %s3571_s5 = smov (!%p38_p9, %s3528_s5), %s2901_s18 }
  0x44   : > { %s222_s9 = ssub.s32 %s2897_s17, %s3569_s29  ;;  %p3529_p11 = scmp.eq.s32.totalorder %s2905_s19, 0 }
  0x45   : > { %p42_p12 = scmp.ge.s32.totalorder %s3571_s5, 2  ;;  %p223_p0 = scmp.eq.s32.totalorder %s222_s9, 0 }
  0x46   : > { %p3135_p7 = por %p232_p13, %p3529_p11  ;;  %p3141_p4 = por %p238_p2, %p3041_p3 }
  0x47   : > { %s381_s30 = sand.u32 1, %s2873_s11   ;;  %s3573_s5 = smov (%p42_p12, %s3571_s5), 0 }
  0x48   : > { %s3531_s28 = scalar_select %p3141_p4, 1, 0 }
  0x49   : > { %3532 = sst [smem:[#allocation22_spill]] %s3573_s5  ;;  %s44_s20 = ssub.s32 %s2901_s18, %s3573_s5 }
  0x4a   : > { %s3149_s23 = scalar_select %p223_p0, %s2873_s11, %s225_s22  }
  0x4b   : > { %p45_p5 = scmp.eq.s32.totalorder %s44_s20, 0  ;;  %s2227_s12 = sshll.u32 %s381_s30, 5 }
  0x4c   : > { %3533 = sst [smem:[#allocation23_spill]] %s3149_s23  ;;  %s2294_s25 = sshll.u32 %s2897_s17, 9 }
  0x4d   : > { %s3534_s0 = sadd.s32 1, %s2885_s14  ;;  %s3536_s7 = sld [smem:[#allocation29_spill]] }
  0x4e   : > { %s3157_s29 = scalar_select %p45_p5, %s2885_s14, %s3534_s0  }
  0x4f   : > { %s385_s8 = scalar_lea.vmem [#allocation7], %s2227_s12  ;;  %p3537_p3 = scmp.lt.s32.totalorder %s2905_s19, 8 }
  0x50   : > { %3535 = sst [smem:[#allocation24_spill]] %s3157_s29  ;;  %s392_s6 = sshll.u32 %s385_s8, 4  ;;  %s3164_s6 = int_to_ptr.vmem [resolvable:$true] %s392_s6 }
  0x51   : > { %p3170_p10 = pnand %p3537_p3, %p3135_p7  ;;  %s3174_s0 = scalar_lea.sflag [#allocation8], %s381_s30 }
  0x53   : > { %s3162_s24 = scalar_lea.hbm %s3536_s7, %s2294_s25  ;;  %p2751_p6 = pneg %p3170_p10 }
  0x54   : > { %s2749_s4 = scalar_lea.hbm %s3162_s24, 512  ;;  %s2754_s25 = scalar_lea.hbm %s3536_s7, 2048 }
  0x55   : > { %p2750_p1 = scmp.ne.s32.totalorder %s3162_s24, %s2749_s4  ;;  %p2755_p2 = scmp.lt.u32.totalorder %s3162_s24, %s3536_s7 }
  0x56   : > { %p2756_p11 = scmp.lt.u32.totalorder %s2754_s25, %s2749_s4  ;;  %p2758_p12 = scmp.lt.u32.totalorder %s2749_s4, %s3162_s24 }
  0x57   : > { %p2752_p9 = pnand %p2751_p6, %p2750_p1 }
  0x58   : > { %p2757_p7 = por %p2756_p11, %p2755_p2 }
  0x59   : > { %p2753_p13 = pneg %p2752_p9 }
  0x5a   : > { %p2759_p0 = por %p2758_p12, %p2757_p7 }
  0x5c   : > { %p2760_p5 = pnand %p2759_p0, %p2753_p13 }
  0x5e   : > { %2763 = shalt.err (!%p2760_p5)
}
  0x5f   : > { %s2764_s30 = scalar_lea.vmem %s3164_s6, 512  ;;  %s2910_s9 = smov [#allocation7]  }
  0x60   : > { %p2765_p3 = scmp.ne.s32.totalorder %s3164_s6, %s2764_s30  ;;  %s2769_s8 = sshll.u32 %s2910_s9, 4  ;;  %s2770_s8 = int_to_ptr.vmem [resolvable:$false] %s2769_s8 }
  0x61   : > { %s2771_s12 = scalar_lea.vmem %s2770_s8, 1024  ;;  %p2772_p4 = scmp.lt.s32.totalorder %s3164_s6, %s2770_s8 }
  0x62   : > { %p2767_p1 = pnand %p2765_p3, %p2751_p6  ;;  %p2773_p2 = scmp.lt.s32.totalorder %s2771_s12, %s2764_s30 }
  0x64   : > { %p2768_p9 = pneg %p2767_p1  ;;  %p2774_p11 = por %p2773_p2, %p2772_p4 }
  0x66   : > { %p2775_p7 = pnand %p2774_p11, %p2768_p9 }
  0x68   : > { %2778 = shalt.err (!%p2775_p7)
}
  0x69   : > { %s3539_s4 = smov 8   ;;  %s3540_s25 = smov 128  }
  0x6a   : > { %2530 = dma.hbm_to_vmem [thread:$0]  (!%p3170_p10), %s3162_s24, 512, %s3164_s6, %s3174_s0, %s3540_s25, %s3540_s25, %s3539_s4  }
  0x6b   : > { %410 = sbr.rel (%p3116_p8) target bundleno = 2900 (0xb54), region = 56  ;;  %s3208_s27 = sand.u32 (!%p3116_p8), 1, %s2881_s13  }
  0x6c   : > { %s2231_s20 = sshll.u32 (!%p3116_p8), %s3208_s27, 4  ;;  %s413_s30 = scalar_lea.sflag (!%p3116_p8), [#allocation5], %s3208_s27 }
  0x6d   : > { %s416_s9 = scalar_lea.vmem (!%p3116_p8), [#allocation4], %s2231_s20  ;;  %p3541_p4 = scmp.ne.s32.totalorder (!%p3116_p8), %s3519_s26, 0 }
  0x72   : > { %2852 = dma.done.wait (%p3541_p4), %s413_s30, 256  }
  0x73   : > { %2854 = vsyncadd (%p3541_p4), %s413_s30, 4294967040  ;;  %s421_s6 = sand.u32 1, %s2869_s10   ;;  %p3542_p8 = scmp.ne.s32.totalorder %s3531_s28, 0 }
  0x74   : > { %s2232_s24 = sshll.u32 %s421_s6, 5  ;;  %s422_s21 = scalar_lea.sflag [#allocation8], %s421_s6 }
  0x75   : > { %s3217_s22 = scalar_lea.vmem [#allocation7], %s2232_s24 }
  0x76   : > { %2856 = dma.done.wait (%p3542_p8), %s422_s21, 512  }
  0x77   : > { %2858 = vsyncadd (%p3542_p8), %s422_s21, 4294966784  ;;  %p496_p10 = scmp.lt.s32.totalorder %s2893_s16, 1  ;;  %p498_p6 = scmp.lt.s32.totalorder %s2889_s15, 3 }
  0x78   : > { %s3543_s23 = sld [smem:[#allocation28_spill]]  ;;  %s3544_s30 = sld [smem:[#allocation30_spill]] }
  0x79   : > { %s497_s26 = scalar_select %p496_p10, %s2893_s16, 1 }
  0x7a   : > { %s3227_s0 = scalar_select %p498_p6, %s2889_s15, 3 }
  0x7b   : > { %s2235_s8 = sshll.u32 %s497_s26, 3  ;;  %s2237_s12 = sshll.u32 %s497_s26, 2 }
  0x7c   : > { %s2234_s4 = sshll.u32 %s3227_s0, 1  ;;  %s3231_s25 = sadd.s32 %s2237_s12, %s3227_s0 }
  0x7d   : > { %s502_s28 = sadd.s32 %s2235_s8, %s2234_s4  ;;  %s511_s24 = scalar_lea.vmem %s3477_s2, %s3231_s25 }
  0x7e   : > { %s2236_s21 = sshll.u32 %s502_s28, 3  ;;  %s518_s18 = scalar_lea.vmem %s3478_s3, %s3231_s25 }
  0x7f   : > { %s3244_s14 = scalar_lea.vmem %s3476_s1, %s2236_s21  ;;  %s2295_s26 = sshll.u32 %s3227_s0, 5 }
  0x80   : > { %s3250_s11 = scalar_lea.vmem %s3543_s23, %s2295_s26  ;;  %s526_s6 = scalar_lea.vmem %s3544_s30, %s3227_s0 }
  0x81   : > { %s3256_s28 = scalar_lea.vmem [#allocation9], %s2231_s20  ;;  %p2241_p13 = scmp.ne.s32.totalorder %s2889_s15, 0 }
  0x82   : > { %v531_v0 = vld [vmem:[%s416_s9] sm:$0xff] (!%p2241_p13)  ;;  %vm535_vm0 = vcmask (!%p2241_p13), 261120   ;;  %v532_v1 = vld [vmem:[%s416_s9 + $0x8] sm:$0xff] (!%p2241_p13)  ;;  %s3545_s17 = sld [smem:[#allocation26_spill]] (!%p2241_p13)  ;;  %s3546_s23 = sld [smem:[#allocation27_spill]] (!%p2241_p13) }
  0x83   : > { %530 = sbr.rel (%p2241_p13) target bundleno = 449 (0x1c1), region = 68  ;;  %v536_v2 = vsel (!%p2241_p13), %vm535_vm0, %v531_v0, 0.0  ;;  %581 = vst.msk [vmem:[#allocation3] sm:$0xff] (!%p2241_p13), %vm535_vm0, %v531_v0  ;;  %582 = vst.msk [vmem:[#allocation3 + $0x8] sm:$0xff] (!%p2241_p13), %vm535_vm0, %v532_v1  ;;  %v539_v3 = vsel (!%p2241_p13), %vm535_vm0, %v532_v1, 0.0 }
  0x84   : > { %537 = vadd.xlane.f32.xlu0 (!%p2241_p13), %v536_v2 }
  0x88   : > { %540 = vadd.xlane.f32.xlu0 (!%p2241_p13), %v539_v3  ;;  %v2242_v21 = vld [vmem:[%s3545_s17] ss:$0 sm:$0xff] (!%p2241_p13) }
  0x89   : > { %v2243_v23 = vld [vmem:[%s3546_s23] ss:$0 sm:$0xff] (!%p2241_p13) }
 0x111   : > { %v538_v4 = vpop.xlane.xlu0 %537 }
 0x112   : > { %v543_v5 = vmul.f32 0.03125, %v538_v4 }
 0x114   : > { %v545_v6 = vsub.f32 %v531_v0, %v543_v5 }
 0x115   : > { %v541_v7 = vpop.xlane.xlu0 %540 }
 0x116   : > { %v544_v8 = vmul.f32 0.03125, %v541_v7  ;;  %v547_v9 = vmul.f32 %v545_v6, %v545_v6 }
 0x118   : > { %v546_v10 = vsub.f32 %v532_v1, %v544_v8  ;;  %v549_v11 = vsel %vm535_vm0, %v547_v9, 0.0 }
 0x119   : > { %550 = vadd.xlane.f32.xlu1 %v549_v11 }
 0x11a   : > { %v548_v12 = vmul.f32 %v546_v10, %v546_v10 }
 0x11c   : > { %v552_v13 = vsel %vm535_vm0, %v548_v12, 0.0 }
 0x11d   : > { %553 = vadd.xlane.f32.xlu1 %v552_v13 }
 0x1a6   : > { %v551_v14 = vpop.xlane.xlu1 %550 }
 0x1a7   : > { %v555_v15 = vmul.f32 0.03125, %v551_v14 }
 0x1a9   : > { %v557_v16 = vadd.f32 1e-05, %v555_v15 }
 0x1aa   : > { %v554_v17 = vpop.xlane.xlu1 %553 }
 0x1ab   : > { %2642 = vrsqrt.f32 %v557_v16  ;;  %v556_v18 = vmul.f32 0.03125, %v554_v17 }
 0x1ad   : > { %v558_v19 = vadd.f32 1e-05, %v556_v18 }
 0x1af   : > { %2644 = vrsqrt.f32 %v558_v19 }
 0x1b5   : > { %v2643_v20 = vpop.eup %2642 }
 0x1b6   : > { %v561_v22 = vmul.f32 %v2643_v20, %v545_v6 }
 0x1b8   : > { %v569_v24 = vmul.f32 %v2242_v21, %v561_v22 }
 0x1b9   : > { %v2645_v25 = vpop.eup %2644 }
 0x1ba   : > { %v577_v26 = vadd.f32 %v2243_v23, %v569_v24  ;;  %v562_v27 = vmul.f32 %v2645_v25, %v546_v10 }
 0x1bc   : > { %579 = vst.msk [vmem:[#allocation2] sm:$0xff] %vm535_vm0, %v577_v26  ;;  %v570_v28 = vmul.f32 %v2242_v21, %v562_v27 }
 0x1be   : > { %v578_v29 = vadd.f32 %v2243_v23, %v570_v28 }
 0x1c0   : > { %580 = vst.msk [vmem:[#allocation2 + $0x8] sm:$0xff] %vm535_vm0, %v578_v29 }
 0x1c1 PF: > { %v585_v30 = vld [vmem:[%s3244_s14] sm:$0xff]  ;;  %v2911_v31 = vmov 0   ;;  %v586_v35 = vld [vmem:[%s3244_s14 + $0x8] sm:$0xff]  ;;  %v687_v38 = vld [vmem:[%s3250_s11 + $0x10] sm:$0xff]  ;;  %v589_v42 = vlaneseq  ;;  %vm603_vm1 = vcmask 130048   ;;  %v2912_v45 = vmov 0.0  }
 0x1c2   : > { %2646 = vset.pattern.permute.xlu0 %v2911_v31  ;;  %v685_v36 = vld [vmem:[%s3250_s11] sm:$0xff]  ;;  %v686_v37 = vld [vmem:[%s3250_s11 + $0x8] sm:$0xff]  ;;  %v688_v40 = vld [vmem:[%s3250_s11 + $0x18] sm:$0xff]  ;;  %vm689_vm4 = vcmask 261120   ;;  %vm783_vm5 = vcmask 64512   ;;  %s2913_s11 = smov 96  }
 0x1c3   : > { %v583_v32 = vld [vmem:[#allocation2] sm:$0xff]  ;;  %592 = vperm.xlu0 %2646, %v585_v30   ;;  %v2460_v39 = vpack.c.bf16 %v686_v37, %v685_v36  ;;  %v2464_v41 = vpack.c.bf16 %v688_v40, %v687_v38  ;;  %v590_v43 = vand.u32 127, %v589_v42  ;;  %s2914_s14 = smov 120   ;;  %s2915_s20 = smov 88   ;;  %vm3301_vm6 = vmpackc.low %vm783_vm5, %vm783_vm5 }
 0x1c4   : > { %s2916_s9 = smov 80   ;;  %s2917_s21 = smov 112  }
 0x1c5   : > { %2461 = vmatprep.subr.bf16.mxu1 %v2460_v39  ;;  %s2918_s26 = smov 56   ;;  %s2919_s12 = smov 72  }
 0x1c6   : > { %2463 = vmatpush3.bf16.msra.mxu1 %v2460_v39  ;;  %s2920_s8 = smov 64   ;;  %s2921_s4 = smov 104  }
 0x1c7   : > { %v584_v33 = vld [vmem:[#allocation2 + $0x8] sm:$0xff]  ;;  %595 = vperm.xlu0 %2646, %v586_v35   ;;  %2465 = vmatprep.subr.bf16.mxu1 %v2464_v41  ;;  %s2922_s30 = smov 48   ;;  %s2923_s7 = smov 40  }
 0x1c8   : > { %v2456_v34 = vpack.c.bf16 %v584_v33, %v583_v32  ;;  %p2287_p12 = scmp.ne.s32.totalorder %s2889_s15, 3 }
 0x1ca   : > { %2457 = vmatprep.subr.bf16.mxu0 %v2456_v34  ;;  %2467 = vmatpush3.bf16.msra.mxu1 %v2464_v41 }
 0x1cb   : > { %2459 = vmatpush3.bf16.msra.mxu0 %v2456_v34 }
 0x242   : > { %v593_v44 = vpop.permute.xlu0 %592 }
 0x243   : > { %vm597_vm2 = vcmp.eq.s32.totalorder %v590_v43, %v593_v44 }
 0x244   : > { %v2244_v46 = vsel %vm597_vm2, 1.0, %v2912_v45 }
 0x245   : > { %2359 = vmatprep.mubr.msk.f32.mxu0 %vm603_vm1, %v2244_v46 }
 0x246   : > { %v596_v47 = vpop.permute.xlu0 %595 }
 0x247   : > { %vm598_vm3 = vcmp.eq.s32.totalorder %v590_v43, %v596_v47 }
 0x248   : > { %v2245_v48 = vsel %vm598_vm3, 1.0, %v2912_v45 }
 0x249   : > { %2360 = vmatmul.mubr.msk.f32.vlgmr.msra.gmra.mrb[0].mxu0 %vm603_vm1, %v2245_v48 }
 0x31c   : > { %v2361_v49 = vpop.f32.mrb[0].mxu0 }
 0x31d   : > { %v676_v50 = vpop.f32.mrb[1].mxu0 }
 0x31e   : > { %2370 = vmatprep.mubr.msk.f32.mxu1 %vm689_vm4, %v676_v50 }
 0x31f   : > { %2371 = vmatmul.mubr.msk.f32.vlgmr.msra.gmra.mrb[0].mxu1 %vm689_vm4, %v2361_v49 }
 0x3f2   : > { %v2372_v51 = vpop.f32.mrb[0].mxu1 }
 0x3f3   : > { %v762_v52 = vpop.f32.mrb[1].mxu1  ;;  %v3294_v55 = vmul.f32 0.35355338, %v2372_v51 }
 0x3f4   : > { %v3284_v53 = vpack.i.bf16 %v2372_v51, %v762_v52  ;;  %v3286_v54 = vmul.f32 0.35355338, %v762_v52 }
 0x3f6   : > { %2648 = vrot.lane.b32.xlu1 %v3284_v53, %s2913_s11  ;;  %978 = vrot.lane.b32.xlu0 %v3286_v54, %s2914_s14 }
 0x3f7   : > { %2377 = vmatprep.mubr.msk.f32.mxu0 %vm783_vm5, %v3286_v54 }
 0x3fa   : > { %2653 = vrot.lane.b32.xlu1 %v3284_v53, %s2915_s20  ;;  %2658 = vrot.lane.b32.xlu0 %v3284_v53, %s2916_s9 }
 0x3fe   : > { %980 = vrot.lane.b32.xlu1 %v3294_v55, %s2914_s14  ;;  %1342 = vrot.lane.b32.xlu0 %v3294_v55, %s2917_s21 }
 0x402   : > { %1340 = vrot.lane.b32.xlu1 %v3286_v54, %s2917_s21 }
 0x468   : > { %v2649_v56 = vpop.permute.xlu1 %2648  ;;  %v979_v57 = vpop.permute.xlu0 %978 }
 0x469   : > { %v2651_v58 = vunpack.i.h.bf16 %v2649_v56  ;;  %v2650_v59 = vunpack.i.l.bf16 %v2649_v56 }
 0x46b   : > { %v2468_v61 = vpack.c.bf16 %v2651_v58, %v2650_v59 }
 0x46c   : > { %v2654_v62 = vpop.permute.xlu1 %2653  ;;  %v2659_v1 = vpop.permute.xlu0 %2658 }
 0x46d   : > { %v2656_v63 = vunpack.i.h.bf16 %v2654_v62  ;;  %v2655_v0 = vunpack.i.l.bf16 %v2654_v62  ;;  %2470 = vmatprep.subr.msk.bf16.mxu0 %vm3301_vm6, %v2468_v61  ;;  %v2661_v3 = vunpack.i.h.bf16 %v2659_v1  ;;  %v2660_v4 = vunpack.i.l.bf16 %v2659_v1 }
 0x46e   : > { %2473 = vmatpush3.bf16.xpose.msk.msra.mxu0 %vm3301_vm6, %v2468_v61 }
 0x46f   : > { %v2478_v2 = vpack.c.bf16 %v2656_v63, %v2655_v0  ;;  %v2488_v5 = vpack.c.bf16 %v2661_v3, %v2660_v4 }
 0x470   : > { %v981_v6 = vpop.permute.xlu1 %980  ;;  %v1343_v8 = vpop.permute.xlu0 %1342 }
 0x471   : > { %2480 = vmatprep.subr.msk.bf16.mxu0 %vm3301_vm6, %v2478_v2 }
 0x474   : > { %v1341_v7 = vpop.permute.xlu1 %1340 }
 0x475   : > { %2378 = vmatmul.mubr.msk.f32.vlgmr.msra.gmra.mrb[2].mxu0 %vm783_vm5, %v3294_v55 }
 0x476   : > { %2483 = vmatpush3.bf16.xpose.msk.msra.mxu0 %vm3301_vm6, %v2478_v2  ;;  %2391 = vmatprep.mubr.msk.f32.mxu0 %vm783_vm5, %v979_v57 }
 0x477   : > { %2490 = vmatprep.subr.msk.bf16.mxu0 %vm3301_vm6, %v2488_v5 }
 0x47d   : > { %2392 = vmatmul.mubr.msk.f32.vlgmr.msra.gmra.mrb[4].mxu0 %vm783_vm5, %v981_v6 }
 0x47e   : > { %2493 = vmatpush3.bf16.xpose.msk.msra.mxu0 %vm3301_vm6, %v2488_v5  ;;  %2415 = vmatprep.mubr.msk.f32.mxu0 %vm783_vm5, %v1341_v7 }
 0x485   : > { %2416 = vmatmul.mubr.msk.f32.vlgmr.msra.gmra.mrb[6].mxu0 %vm783_vm5, %v1343_v8 }
 0x548   : > { %v2379_v9 = vpop.f32.mrb[2].mxu0 }
 0x549   : > { %v860_v10 = vpop.f32.mrb[3].mxu0  ;;  %v872_v11 = vsel %vm603_vm1, %v2379_v9, -inf }
 0x54a   : > { %873 = vmax.xlane.f32.xlu0 %v872_v11  ;;  %v869_v12 = vsel %vm603_vm1, %v860_v10, -inf }
 0x54b   : > { %870 = vmax.xlane.f32.xlu1 %v869_v12 }
 0x550   : > { %v2393_v13 = vpop.f32.mrb[4].mxu0 }
 0x551   : > { %v1060_v14 = vpop.f32.mrb[5].mxu0  ;;  %v1072_v15 = vsel %vm603_vm1, %v2393_v13, -inf }
 0x552   : > { %1073 = vmax.xlane.f32.xlu1 %v1072_v15  ;;  %v1069_v16 = vsel %vm603_vm1, %v1060_v14, -inf  ;;  %v771_v15 = vld [vmem:[%s3217_s22] sm:$0xff] }
 0x553   : > { %1070 = vmax.xlane.f32.xlu0 %v1069_v16 }
 0x558   : > { %v3327_v17 = vpop.f32.mrb[6].mxu0 }
 0x559   : > { %v3329_v18 = vpop.f32.mrb[7].mxu0  ;;  %v1434_v40 = vsel %vm603_vm1, %v3327_v17, -inf }
 0x55a   : > { %v1431_v39 = vsel %vm603_vm1, %v3329_v18, -inf }
 0x5d7   : > { %v874_v19 = vpop.xlane.xlu0 %873 }
 0x5d8   : > { %v876_v20 = vsub.f32 %v2379_v9, %v874_v19  ;;  %v871_v21 = vpop.xlane.xlu1 %870 }
 0x5d9   : > { %v875_v22 = vsub.f32 %v860_v10, %v871_v21 }
 0x5da   : > { %v879_v23 = vmul.f32 1.442695, %v876_v20 }
 0x5db   : > { %v877_v24 = vmul.f32 1.442695, %v875_v22 }
 0x5dc   : > { %2687 = vpow2.f32 %v879_v23 }
 0x5dd   : > { %2689 = vpow2.f32 %v877_v24 }
 0x5df   : > { %v1074_v25 = vpop.xlane.xlu1 %1073 }
 0x5e0   : > { %v1076_v26 = vsub.f32 %v2393_v13, %v1074_v25  ;;  %v1071_v27 = vpop.xlane.xlu0 %1070 }
 0x5e1   : > { %v1075_v28 = vsub.f32 %v1060_v14, %v1071_v27  ;;  %v772_v14 = vld [vmem:[%s3217_s22 + $0x8] sm:$0xff] }
 0x5e2   : > { %v1079_v29 = vmul.f32 1.442695, %v1076_v26 }
 0x5e3   : > { %v1077_v30 = vmul.f32 1.442695, %v1075_v28 }
 0x5e4   : > { %2691 = vpow2.f32 %v1079_v29 }
 0x5e5   : > { %2693 = vpow2.f32 %v1077_v30 }
 0x5e6   : > { %v2688_v31 = vpop.eup %2687 }
 0x5e7   : > { %v2690_v32 = vpop.eup %2689  ;;  %v884_v33 = vsel %vm603_vm1, %v2688_v31, 0.0 }
 0x5e8   : > { %885 = vadd.xlane.f32.xlu1 %v884_v33  ;;  %v881_v34 = vsel %vm603_vm1, %v2690_v32, 0.0 }
 0x5e9   : > { %882 = vadd.xlane.f32.xlu0 %v881_v34  ;;  %v773_v34 = vld [vmem:[%s3217_s22 + $0x10] sm:$0xff] }
 0x5ee   : > { %v2692_v35 = vpop.eup %2691 }
 0x5ef   : > { %v2694_v36 = vpop.eup %2693  ;;  %v1084_v37 = vsel %vm603_vm1, %v2692_v35, 0.0 }
 0x5f0   : > { %1085 = vadd.xlane.f32.xlu1 %v1084_v37  ;;  %v1081_v38 = vsel %vm603_vm1, %v2694_v36, 0.0 }
 0x5f1   : > { %1082 = vadd.xlane.f32.xlu0 %v1081_v38 }
 0x601   : > { %2668 = vrot.lane.b32.xlu1 %v3284_v53, %s2918_s26 }
 0x605   : > { %2673 = vrot.lane.b32.xlu1 %v3284_v53, %s2919_s12 }
 0x607   : > { %2663 = vrot.lane.b32.xlu0 %v3284_v53, %s2920_s8 }
 0x609   : > { %1625 = vrot.lane.b32.xlu1 %v3294_v55, %s2921_s4 }
 0x60b   : > { %1623 = vrot.lane.b32.xlu0 %v3286_v54, %s2921_s4 }
 0x62a   : > { %1432 = vmax.xlane.f32.xlu0 %v1431_v39 }
 0x62d   : > { %1435 = vmax.xlane.f32.xlu1 %v1434_v40 }
 0x63e   : > { %2678 = vrot.lane.b32.xlu1 %v3284_v53, %s2922_s30 }
 0x642   : > { %2683 = vrot.lane.b32.xlu1 %v3284_v53, %s2923_s7 }
 0x675   : > { %v886_v43 = vpop.xlane.xlu1 %885 }
 0x676   : > { %v883_v41 = vpop.xlane.xlu0 %882 }
 0x677   : > { %2695 = vrcp.f32 %v883_v41 }
 0x678   : > { %2697 = vrcp.f32 %v886_v43 }
 0x67d   : > { %v1086_v44 = vpop.xlane.xlu1 %1085 }
 0x67e   : > { %v1083_v45 = vpop.xlane.xlu0 %1082 }
 0x67f   : > { %2699 = vrcp.f32 %v1083_v45 }
 0x680   : > { %2701 = vrcp.f32 %v1086_v44 }
 0x681   : > { %v2696_v46 = vpop.eup %2695  ;;  %v2669_v47 = vpop.permute.xlu1 %2668 }
 0x682   : > { %v2664_v48 = vpop.permute.xlu0 %2663  ;;  %v889_v49 = vmul.f32 %v2696_v46, %v2690_v32  ;;  %v2671_v50 = vunpack.i.h.bf16 %v2669_v47  ;;  %v2670_v51 = vunpack.i.l.bf16 %v2669_v47  ;;  %v2698_v56 = vpop.eup %2697 }
 0x683   : > { %v2666_v52 = vunpack.i.h.bf16 %v2664_v48  ;;  %v2665_v54 = vunpack.i.l.bf16 %v2664_v48  ;;  %v890_v0 = vmul.f32 %v2698_v56, %v2688_v31 }
 0x684   : > { %2384 = vmatprep.mubr.msk.f32.mxu1 %vm603_vm1, %v889_v49  ;;  %v2484_v61 = vpack.c.bf16 %v2671_v50, %v2670_v51 }
 0x685   : > { %v2474_v55 = vpack.c.bf16 %v2666_v52, %v2665_v54  ;;  %v2674_v53 = vpop.permute.xlu1 %2673  ;;  %v774_v52 = vld [vmem:[%s3217_s22 + $0x18] sm:$0xff] }
 0x686   : > { %v2676_v57 = vunpack.i.h.bf16 %v2674_v53  ;;  %v2675_v58 = vunpack.i.l.bf16 %v2674_v53  ;;  %v1624_v59 = vpop.permute.xlu0 %1623 }
 0x687   : > { %2475 = vmatprep.subr.bf16.mxu1 %v2474_v55  ;;  %2434 = vmatprep.mubr.msk.f32.mxu0 %vm783_vm5, %v1624_v59 }
 0x688   : > { %v2498_v62 = vpack.c.bf16 %v2676_v57, %v2675_v58  ;;  %2477 = vmatpush3.bf16.msra.mxu1 %v2474_v55 }
 0x689   : > { %v2700_v63 = vpop.eup %2699  ;;  %2485 = vmatprep.subr.bf16.mxu1 %v2484_v61  ;;  %v1626_v4 = vpop.permute.xlu1 %1625 }
 0x68a   : > { %v2702_v1 = vpop.eup %2701  ;;  %2500 = vmatprep.subr.msk.bf16.mxu0 %vm3301_vm6, %v2498_v62  ;;  %v1089_v2 = vmul.f32 %v2700_v63, %v2694_v36  ;;  %v2283_v63 = vld [vmem:[%s511_s24] ss:$0 sm:$0xff] }
 0x68b   : > { %2385 = vmatmul.mubr.msk.f32.vlgmr.msra.gmra.mrb[2].mxu1 %vm603_vm1, %v890_v0  ;;  %2503 = vmatpush3.bf16.xpose.msk.msra.mxu0 %vm3301_vm6, %v2498_v62  ;;  %v1090_v3 = vmul.f32 %v2702_v1, %v2692_v35  ;;  %v1916_v62 = vshrl.u32 %v589_v42, 7  ;;  %v2284_v0 = vld [vmem:[%s518_s18] ss:$0 sm:$0xff] }
 0x68c   : > { %2487 = vmatpush3.bf16.msra.mxu1 %v2484_v61  ;;  %2398 = vmatprep.mubr.msk.f32.mxu1 %vm603_vm1, %v1089_v2  ;;  %v2282_v42 = vld [vmem:[%s526_s6] ss:$0 sm:$0xff] }
 0x68d   : > { %2401 = vmatprep.subr.mxu1 %v772_v14  ;;  %v1917_v1 = vadd.s32 8, %v1916_v62  ;;  %vm1922_vm7 = vcmp.eq.s32.totalorder %v1916_v62, %v2283_v63 }
 0x68e   : > { %v1930_v2 = vsel %vm1922_vm7, %v2284_v0, 0.0 }
 0x68f   : > { %2399 = vmatmul.mubr.msk.f32.vlgmr.msra.gmra.mrb[4].mxu1 %vm603_vm1, %v1090_v3  ;;  %vm1923_vm8 = vcmp.eq.s32.totalorder %v1917_v1, %v2283_v63 }
 0x690   : > { %2402 = vmatpush3.msra.mxu1 %v772_v14  ;;  %v1931_v3 = vsel %vm1923_vm8, %v2284_v0, 0.0 }
 0x691   : > { %2406 = vmatprep.subr.mxu1 %v771_v15 }
 0x692   : > { %2435 = vmatmul.mubr.msk.f32.vlgmr.msra.gmra.mrb[8].mxu0 %vm783_vm5, %v1626_v4 }
 0x693   : > { %2453 = vmatprep.mubr.msk.f32.mxu0 %vm603_vm1, %v1930_v2 }
 0x6b7   : > { %v1433_v5 = vpop.xlane.xlu0 %1432 }
 0x6b8   : > { %v1437_v6 = vsub.f32 %v3329_v18, %v1433_v5 }
 0x6ba   : > { %v1439_v7 = vmul.f32 1.442695, %v1437_v6  ;;  %v1436_v8 = vpop.xlane.xlu1 %1435 }
 0x6bb   : > { %v1438_v9 = vsub.f32 %v3327_v17, %v1436_v8 }
 0x6bc   : > { %2703 = vpow2.f32 %v1439_v7 }
 0x6bd   : > { %v1441_v60 = vmul.f32 1.442695, %v1438_v9  ;;  %v1933_v9 = vld [vmem:[#allocation3 + $0x8] sm:$0xff] }
 0x6be   : > { %v2679_v18 = vpop.permute.xlu1 %2678 }
 0x6bf   : > { %2705 = vpow2.f32 %v1441_v60  ;;  %v2681_v21 = vunpack.i.h.bf16 %v2679_v18  ;;  %v2680_v22 = vunpack.i.l.bf16 %v2679_v18  ;;  %v1932_v60 = vld [vmem:[#allocation3] sm:$0xff] }
 0x6c1   : > { %v2494_v25 = vpack.c.bf16 %v2681_v21, %v2680_v22 }
 0x6c2   : > { %v2684_v30 = vpop.permute.xlu1 %2683 }
 0x6c3   : > { %v2686_v35 = vunpack.i.h.bf16 %v2684_v30  ;;  %v2685_v36 = vunpack.i.l.bf16 %v2684_v30 }
 0x6c5   : > { %v2504_v38 = vpack.c.bf16 %v2686_v35, %v2685_v36 }
 0x6c6   : > { %v2704_v10 = vpop.eup %2703 }
 0x6c7   : > { %v1443_v11 = vsel %vm603_vm1, %v2704_v10, 0.0 }
 0x6c8   : > { %1444 = vadd.xlane.f32.xlu0 %v1443_v11 }
 0x6c9   : > { %v2706_v12 = vpop.eup %2705 }
 0x6ca   : > { %v1446_v13 = vsel %vm603_vm1, %v2706_v12, 0.0 }
 0x6cc   : > { %1447 = vadd.xlane.f32.xlu0 %v1446_v13 }
 0x755   : > { %v1445_v16 = vpop.xlane.xlu0 %1444 }
 0x756   : > { %2707 = vrcp.f32 %v1445_v16 }
 0x759   : > { %v1448_v17 = vpop.xlane.xlu0 %1447 }
 0x75a   : > { %2709 = vrcp.f32 %v1448_v17 }
 0x75e   : > { %v2386_v19 = vpop.f32.mrb[2].mxu1 }
 0x75f   : > { %v969_v20 = vpop.f32.mrb[3].mxu1 }
 0x760   : > { %v2708_v29 = vpop.eup %2707 }
 0x761   : > { %v1451_v33 = vmul.f32 %v2708_v29, %v2704_v10 }
 0x762   : > { %v2400_v23 = vpop.f32.mrb[4].mxu1 }
 0x763   : > { %v1169_v24 = vpop.f32.mrb[5].mxu1 }
 0x764   : > { %2403 = vmatprep.mubr.msk.f32.mxu1 %vm783_vm5, %v1169_v24  ;;  %v2710_v32 = vpop.eup %2709 }
 0x765   : > { %2404 = vmatmul.mubr.msk.f32.vlgmr.msra.gmra.mrb[6].mxu1 %vm783_vm5, %v2400_v23  ;;  %v2436_v26 = vpop.f32.mrb[8].mxu0  ;;  %v1452_v37 = vmul.f32 %v2710_v32, %v2706_v12 }
 0x766   : > { %2407 = vmatpush3.msra.mxu1 %v771_v15  ;;  %2408 = vmatprep.mubr.msk.f32.mxu1 %vm783_vm5, %v969_v20  ;;  %v1705_v27 = vpop.f32.mrb[9].mxu0  ;;  %v1717_v31 = vsel %vm603_vm1, %v2436_v26, -inf }
 0x767   : > { %2495 = vmatprep.subr.bf16.mxu1 %v2494_v25  ;;  %v1714_v28 = vsel %vm603_vm1, %v1705_v27, -inf }
 0x768   : > { %1715 = vmax.xlane.f32.xlu0 %v1714_v28 }
 0x76c   : > { %1718 = vmax.xlane.f32.xlu0 %v1717_v31 }
 0x76d   : > { %2409 = vmatmul.mubr.msk.f32.vlgmr.msra.gmra.mrb[6].mxu1 %vm783_vm5, %v2386_v19 }
 0x76e   : > { %2497 = vmatpush3.bf16.msra.mxu1 %v2494_v25  ;;  %2422 = vmatprep.mubr.msk.f32.mxu1 %vm603_vm1, %v1451_v33 }
 0x76f   : > { %2425 = vmatprep.subr.mxu1 %v773_v34 }
 0x771   : > { %2423 = vmatmul.mubr.msk.f32.vlgmr.msra.gmra.mrb[8].mxu1 %vm603_vm1, %v1452_v37 }
 0x772   : > { %2426 = vmatpush3.msra.mxu1 %v773_v34 }
 0x773   : > { %2505 = vmatprep.subr.bf16.mxu1 %v2504_v38 }
 0x7f5   : > { %v1716_v39 = vpop.xlane.xlu0 %1715 }
 0x7f6   : > { %v1720_v40 = vsub.f32 %v1705_v27, %v1716_v39 }
 0x7f8   : > { %v1722_v41 = vmul.f32 1.442695, %v1720_v40 }
 0x7f9   : > { %v1719_v43 = vpop.xlane.xlu0 %1718 }
 0x7fa   : > { %2711 = vpow2.f32 %v1722_v41  ;;  %v1721_v44 = vsub.f32 %v2436_v26, %v1719_v43 }
 0x7fc   : > { %v1724_v45 = vmul.f32 1.442695, %v1721_v44 }
 0x7fe   : > { %2713 = vpow2.f32 %v1724_v45 }
 0x804   : > { %v2712_v46 = vpop.eup %2711 }
 0x805   : > { %v1726_v47 = vsel %vm603_vm1, %v2712_v46, 0.0 }
 0x806   : > { %1727 = vadd.xlane.f32.xlu0 %v1726_v47 }
 0x808   : > { %v2714_v48 = vpop.eup %2713 }
 0x809   : > { %v1729_v49 = vsel %vm603_vm1, %v2714_v48, 0.0 }
 0x80a   : > { %1730 = vadd.xlane.f32.xlu0 %v1729_v49 }
 0x844   : > { %v2424_v50 = vpop.f32.mrb[8].mxu1 }
 0x845   : > { %v1531_v51 = vpop.f32.mrb[9].mxu1 }
 0x846   : > { %2427 = vmatprep.mubr.msk.f32.mxu1 %vm783_vm5, %v1531_v51 }
 0x847   : > { %2428 = vmatmul.mubr.msk.f32.vlgmr.msra.gmra.mrb[6].mxu1 %vm783_vm5, %v2424_v50 }
 0x848   : > { %2507 = vmatpush3.bf16.msra.mxu1 %v2504_v38 }
 0x849   : > { %2444 = vmatprep.subr.mxu1 %v774_v52 }
 0x893   : > { %v1728_v54 = vpop.xlane.xlu0 %1727 }
 0x894   : > { %2715 = vrcp.f32 %v1728_v54 }
 0x897   : > { %v1731_v55 = vpop.xlane.xlu0 %1730 }
 0x898   : > { %2717 = vrcp.f32 %v1731_v55 }
 0x89e   : > { %v2716_v53 = vpop.eup %2715 }
 0x89f   : > { %v1734_v56 = vmul.f32 %v2716_v53, %v2712_v46 }
 0x8a1   : > { %2441 = vmatprep.mubr.msk.f32.mxu1 %vm603_vm1, %v1734_v56 }
 0x8a2   : > { %v2718_v57 = vpop.eup %2717 }
 0x8a3   : > { %v1735_v58 = vmul.f32 %v2718_v57, %v2714_v48 }
 0x8a5   : > { %2442 = vmatmul.mubr.msk.f32.vlgmr.msra.gmra.mrb[10].mxu1 %vm603_vm1, %v1735_v58 }
 0x8a6   : > { %2445 = vmatpush3.msra.mxu1 %v774_v52 }
 0x978   : > { %v2443_v59 = vpop.f32.mrb[10].mxu1 }
 0x979   : > { %v1814_v61 = vpop.f32.mrb[11].mxu1 }
 0x97a   : > { %2446 = vmatprep.mubr.msk.f32.mxu1 %vm783_vm5, %v1814_v61 }
 0x97b   : > { %2447 = vmatmul.mubr.msk.f32.vlgmr.msra.gmra.mrb[6].mxu1 %vm783_vm5, %v2443_v59 }
 0xa4e   : > { %v2448_v4 = vpop.f32.mrb[6].mxu1 }
 0xa4f   : > { %v1914_v5 = vadd.f32 %v2448_v4, %v2282_v42  ;;  %v1895_v6 = vpop.f32.mrb[7].mxu1 }
 0xa50   : > { %v1913_v7 = vadd.f32 %v2282_v42, %v1895_v6 }
 0xa52   : > { %v2508_v8 = vpack.c.bf16 %v1914_v5, %v1913_v7 }
 0xa54   : > { %2509 = vmatprep.subr.bf16.mxu0 %v2508_v8 }
 0xa55   : > { %2511 = vmatpush3.bf16.msra.mxu0 %v2508_v8 }
 0xa58   : > { %2454 = vmatmul.mubr.msk.f32.vlgmr.msra.gmra.mrb[10].mxu0 %vm603_vm1, %v1931_v3 }
 0xb29   : > { %2022 = sbr.rel (%p2287_p12) target bundleno = 2872 (0xb38), region = 72 }
 0xb2b   : > { %v2455_v10 = vpop.f32.mrb[10].mxu0 }
 0xb2c   : > { %v2016_v11 = vadd.f32 %v2455_v10, %v1933_v9  ;;  %v2006_v12 = vpop.f32.mrb[11].mxu0 }
 0xb2d   : > { %v2015_v13 = vadd.f32 %v2006_v12, %v1932_v60 }
 0xb2e   : > { %2018 = vst.msk [vmem:[#allocation3 + $0x8] sm:$0xff] %vm689_vm4, %v2016_v11 }
 0xb2f   : > { %2017 = vst.msk [vmem:[#allocation3] sm:$0xff] %vm689_vm4, %v2015_v13 }
 0xb35   : > { %v2024_v15 = vld [vmem:[#allocation3 + $0x8] sm:$0xff] }
 0xb36   : > { %v2023_v14 = vld [vmem:[#allocation3] sm:$0xff]  ;;  %2026 = vst.msk [vmem:[%s3256_s28 + $0x8] sm:$0xff] %vm689_vm4, %v2024_v15 }
 0xb37   : > { %2025 = vst.msk [vmem:[%s3256_s28] sm:$0xff] %vm689_vm4, %v2023_v14 }
 0xb38 PF: > { %s3550_s18 = sld [smem:[#allocation19_spill]]  ;;  %s2296_s0 = sshll.u32 %s2893_s16, 8 }
 0xb39   : > { %s3551_s6 = sld [smem:[#allocation31_spill]]  ;;  %s2041_s15 = sshll.u32 %s3256_s28, 4  ;;  %s3412_s15 = int_to_ptr.vmem [resolvable:$true] %s2041_s15 }
 0xb3a   : > { %s2028_s20 = scalar_lea.sflag [#allocation6], %s3208_s27  ;;  %s2779_s9 = scalar_lea.vmem %s3412_s15, 256 }
 0xb3b   : > { %p2780_p0 = scmp.ne.s32.totalorder %s3412_s15, %s2779_s9  ;;  %s2924_s21 = smov [#allocation9]  }
 0xb3c   : > { %s2783_s26 = sshll.u32 %s2924_s21, 4  ;;  %s2784_s26 = int_to_ptr.vmem [resolvable:$false] %s2783_s26 }
 0xb3d   : > { %s2785_s16 = scalar_lea.vmem %s2784_s26, 512  ;;  %p2786_p9 = scmp.lt.s32.totalorder %s3412_s15, %s2784_s26 }
 0xb3e   : > { %p3552_p5 = scmp.ne.s32.totalorder %s3550_s18, 0  ;;  %p2787_p2 = scmp.lt.s32.totalorder %s2785_s16, %s2779_s9 }
 0xb3f   : > { %s3409_s14 = scalar_lea.hbm %s3551_s6, %s2296_s0 }
 0xb40   : > { %p2781_p3 = pnand %p2780_p0, %p3552_p5  ;;  %p2788_p11 = por %p2787_p2, %p2786_p9 }
 0xb42   : > { %p2782_p1 = pneg %p2781_p3 }
 0xb44   : > { %p2789_p7 = pnand %p2788_p11, %p2782_p1 }
 0xb46   : > { %2792 = shalt.err (!%p2789_p7)
}
 0xb47   : > { %s2793_s28 = scalar_lea.hbm %s3409_s14, 256  ;;  %s2797_s4 = scalar_lea.hbm %s3551_s6, 512 }
 0xb48   : > { %p2794_p4 = scmp.ne.s32.totalorder %s3409_s14, %s2793_s28  ;;  %p2798_p6 = scmp.lt.u32.totalorder %s3409_s14, %s3551_s6 }
 0xb49   : > { %p2799_p13 = scmp.lt.u32.totalorder %s2797_s4, %s2793_s28  ;;  %p2801_p0 = scmp.lt.u32.totalorder %s2793_s28, %s3409_s14 }
 0xb4a   : > { %p2795_p8 = pnand %p2794_p4, %p3552_p5 }
 0xb4b   : > { %p2800_p12 = por %p2799_p13, %p2798_p6 }
 0xb4c   : > { %p2796_p10 = pneg %p2795_p8 }
 0xb4d   : > { %p2802_p3 = por %p2801_p0, %p2800_p12 }
 0xb4f   : > { %p2803_p1 = pnand %p2802_p3, %p2796_p10 }
 0xb51   : > { %2806 = shalt.err (!%p2803_p1)
}
 0xb52   : > { %s2925_s22 = smov 128   ;;  %s2926_s13 = smov 8  }
 0xb53   : > { %2522 = dma.vmem_to_hbm [thread:$0]  (%p3552_p5), %s3412_s15, 256, %s3409_s14, %s2028_s20, %s2925_s22, %s2925_s22, %s2926_s13  }
 0xb54 PF: > { %s3553_s17 = sld [smem:[#allocation14_spill]]  ;;  %s3554_s29 = sld [smem:[#allocation20_spill]] }
 0xb55   : > { %p2536_p9 = scmp.ge.s32.totalorder %s2905_s19, 2 }
 0xb5a   : > { %s2056_s5 = sand.u32 1, %s3553_s17   ;;  %p3555_p2 = scmp.ne.s32.totalorder %s3554_s29, 0 }
 0xb5b   : > { %s2057_s23 = scalar_lea.sflag [#allocation6], %s2056_s5 }
 0xb5c   : > { %p2532_p11 = pnand %p2536_p9, %p3555_p2 }
 0xb5e   : > { %2860 = dma.done.wait (!%p2532_p11), %s2057_s23, 256  }
 0xb5f   : > { %2862 = vsyncadd (!%p2532_p11), %s2057_s23, 4294967040  ;;  %s28_s19 = sadd.s32 1, %s2905_s19   ;;  %s3556_s11 = sld [smem:[#allocation13_spill]] }
 0xb60   : > { %p25_p7 = scmp.ge.s32.totalorder %s28_s19, 10   ;;  %s3557_s0 = sld [smem:[#allocation23_spill]] }
 0xb61   : > { %s3558_s12 = sld [smem:[#allocation15_spill]]  ;;  %s3559_s13 = sld [smem:[#allocation16_spill]] }
 0xb62   : > { %s3560_s14 = sld [smem:[#allocation24_spill]]  ;;  %s3561_s15 = sld [smem:[#allocation17_spill]] }
 0xb63   : > { %s3562_s16 = sld [smem:[#allocation18_spill]]  ;;  %s3563_s17 = sld [smem:[#allocation21_spill]] }
 0xb64   : > { %s3564_s18 = sld [smem:[#allocation22_spill]]  ;;  %s3565_s30 = smov %s2869_s10 }
 0xb65   : > { %s3566_s10 = smov %s3556_s11  ;;  %27 = sbr.rel (!%p25_p7) target bundleno = 19 (0x13), region = 137 }
 0xb66   : > { %s3567_s11 = smov %s3557_s0 }
 0xb6c   :  { %2062 = vsyncpa [#allocation5], 1 }
 0xb6d   :  { %2064 = vsyncpa [#allocation5 + $0x1], 1 }
 0xb6e   :  { %2065 = vsyncpa [#allocation8], 1 }
 0xb6f   :  { %2067 = vsyncpa [#allocation8 + $0x1], 1 }
 0xb70   :  { %2068 = vsyncpa [#allocation6], 1 }
 0xb71   :  { %2070 = vsyncpa [#allocation6 + $0x1], 1 }

</bundles_post_ra>
